<compile_context>
chip_gen: v6e
topology: v6e:2x2x1
jax: 0.10.0
libtpu: 0.0.40
codegen_flags: <defaults>
</compile_context>

<pallas_src>
import math
import itertools

import numpy as np
import jax
import jax.numpy as jnp
from jax.experimental import pallas as pl
from jax.experimental.pallas import tpu as pltpu


# ----------------------------------------------------------------------------
# Clifford algebra Cl(d, 0): cayley[i, j, k] = coeff of blade j in e_i * e_k
# ----------------------------------------------------------------------------
def _blade_product(a, b):
    arr = list(a) + list(b)
    sign = 1
    i = 0
    while i < len(arr) - 1:
        if arr[i] == arr[i + 1]:          # e_a e_a = +1 (euclidean metric)
            del arr[i + 1]
            del arr[i]
            i = max(i - 1, 0)
        elif arr[i] > arr[i + 1]:
            arr[i], arr[i + 1] = arr[i + 1], arr[i]
            sign = -sign
            i = max(i - 1, 0)
        else:
            i += 1
    return sign, tuple(arr)


def build_cayley(dim):
    blades = [()]
    for g in range(1, dim + 1):
        blades += list(itertools.combinations(range(dim), g))
    index = {b: i for i, b in enumerate(blades)}
    n = len(blades)
    cayley = np.zeros((n, n, n), dtype=np.float32)
    for i, bi in enumerate(blades):
        for k, bk in enumerate(blades):
            sign, res = _blade_product(bi, bk)
            cayley[i, index[res], k] += sign
    return cayley


def build_pe(seq_len, d_model):
    position = np.arange(seq_len, dtype=np.float32)[:, None]
    div_term = np.exp(np.arange(0, d_model, 2, dtype=np.float32)
                      * (-math.log(10000.0) / d_model))
    pe = np.zeros((seq_len, d_model), dtype=np.float32)
    pe[:, 0::2] = np.sin(position * div_term)
    ncos = pe[:, 1::2].shape[1]
    pe[:, 1::2] = np.cos(position * div_term[:ncos])
    return pe


# ----------------------------------------------------------------------------
# Fused Pallas kernel: one grid step == (batch b, encoder layer l)
# ----------------------------------------------------------------------------
def mvformer_kernel(src_ref, emb_ref, selt_ref, selw_ref,
                    wqk_ref, wdh_ref, md_ref, vh_ref, o_ref):
    layer = pl.program_id(1)
    S = src_ref.shape[1]
    D = src_ref.shape[2]
    H = vh_ref.shape[2]
    SS, DD, SD = S * S, D * D, S * D

    # ---- constant 0/1 selector matrices (shared by every layer / batch) ----
    # They turn all gather / repeat / segment-sum steps into plain MXU GEMMs
    # (no in-kernel reshapes / transposes / lane-sparse concatenations).
    selt = selt_ref[...]
    r = 0
    rep_row_q = selt[r:r + SS, 0:S]; r += SS     # (S*S, S): row (q,k) <- row q
    tile_row_k = selt[r:r + SS, 0:S]; r += SS    # (S*S, S): row (q,k) <- row k
    sum_over_i = selt[r:r + DD, 0:D]; r += DD    # (D*D, D): col (i,j) -> col j
    rep_row_m = selt[r:r + SD, 0:S]; r += SD     # (S*D, S): row (m,i) <- row m
    blk_eye = selt[r:r + SD, 0:D]                # (S*D, D): delta(i, i')
    selw = selw_ref[...]
    cay_l_ij = selw[0:D, 0:DD]                   # (D, D*D): [l,(i,j)] = cayley[i,j,l]
    rep_col_i = selw[D:2 * D, 0:DD]              # (D, D*D): col (i,j) <- col i
    sum_over_k = selw[2 * D:2 * D + S, 0:SS]     # (S, S*S): sum over k per q

    # ---- per-layer parameters (packed to keep input / DMA count small) ----
    wqk = wqk_ref[0]                             # (2, S, S*D) bf16: MVLinear wq / wk
    wdh = wdh_ref[0]                             # (2, D, H)  : score-MLP W1, fc_in
    md = md_ref[0]                               # (D+H+2S+9, D)
    vh = vh_ref[0]                               # (3, H)     : b1a, b_in, w2a^T
    w1a, w_in = wdh[0], wdh[1]
    wv = md[0:D, :]                              # value projection (D, D)
    w_out = md[D:D + H, :]                       # fc_out (H, D)
    bq = md[D + H:D + H + S, :]                  # MVLinear biases (S, D)
    bk = md[D + H + S:D + H + 2 * S, :]
    vr = D + H + 2 * S
    n1g = md[vr + 0:vr + 1, :]; n1b = md[vr + 1:vr + 2, :]
    gpg = md[vr + 2:vr + 3, :]; gpb = md[vr + 3:vr + 4, :]
    bv = md[vr + 4:vr + 5, :]; bo = md[vr + 5:vr + 6, :]
    n2g = md[vr + 6:vr + 7, :]; n2b = md[vr + 7:vr + 8, :]
    b2a = md[vr + 8:vr + 9, 0:1]                 # (1, 1)
    b1a = vh[0:1, :]; b_in = vh[1:2, :]; w2a_t = vh[2:3, :]

    # ---- layer 0: algebra embedding (Linear 3->D zero-padded) + pos. enc. ----
    @pl.when(layer == 0)
    def _():
        emb = emb_ref[...]
        o_ref[0] = (jnp.dot(src_ref[0], emb[0:D, :],
                            preferred_element_type=jnp.float32)
                    + emb[D:D + S, :])           # pe already has emb bias folded in

    x = o_ref[0]                                 # (S, D) activation carried in VMEM

    def layernorm(v, g, b):
        mu = jnp.mean(v, axis=-1, keepdims=True)
        var = jnp.mean(jnp.square(v - mu), axis=-1, keepdims=True)
        return (v - mu) * jax.lax.rsqrt(var + 1e-5) * g + b

    xn = layernorm(x, n1g, n1b)                                           # norm1

    # value projection (MXU)
    v = jnp.dot(xn, wv, preferred_element_type=jnp.float32) + bv          # (S, D)

    # MVLinear q/k projections as MXU GEMMs:
    #   xblk[(m,i), i'] = xn[m, i] * delta(i, i')     (block-diagonal expansion)
    #   q_lin[n, i]     = sum_m wq[n, m, i] * xn[m, i]
    xblk = jnp.dot(rep_row_m, xn, preferred_element_type=jnp.float32) * blk_eye
    xblk16 = xblk.astype(jnp.bfloat16)
    q_lin = jnp.dot(wqk[0], xblk16, preferred_element_type=jnp.float32) + bq
    k_lin = jnp.dot(wqk[1], xblk16, preferred_element_type=jnp.float32) + bk
    q = layernorm(q_lin, gpg, gpb)
    k = layernorm(k_lin, gpg, gpb)

    # pairwise geometric product for ALL (q, k) pairs at once (no per-k loop):
    #   gp[(q,k), j] = sum_{i,l} q[q,i] * cayley[i,j,l] * k[k,l]
    u = jnp.dot(k, cay_l_ij, preferred_element_type=jnp.float32)          # (S, D*D)
    u_rep = jnp.dot(tile_row_k, u, preferred_element_type=jnp.float32)    # (S*S, D*D)
    q_rep = jnp.dot(rep_row_q,
                    jnp.dot(q, rep_col_i, preferred_element_type=jnp.float32),
                    preferred_element_type=jnp.float32)                   # (S*S, D*D)
    gp = jnp.dot(q_rep * u_rep, sum_over_i,
                 preferred_element_type=jnp.float32)                      # (S*S, D)

    # attention-score MLP: two big ops instead of S tiny matmuls + lane concats
    h = jnp.maximum(jnp.dot(gp, w1a, preferred_element_type=jnp.float32) + b1a, 0.0)
    s_flat = jnp.sum(h * w2a_t, axis=-1, keepdims=True) + b2a             # (S*S, 1)

    # softmax over k (a global shift is exact for softmax)
    e = jnp.exp(s_flat - jnp.max(s_flat, axis=0, keepdims=True))          # (S*S, 1)
    denom = jnp.dot(sum_over_k, e, preferred_element_type=jnp.float32)    # (S, 1)
    row_prob_sum = denom * pl.reciprocal(denom, approx=True)              # ~= 1
    # Reference einsum('bqk,bvd->bqd', probs, v) factorises exactly as
    # rowsum(probs) (outer) colsum(v); the whole q/k/score path only reaches
    # the output through rowsum(softmax) ~ 1 (kept for faithfulness).
    attn = row_prob_sum * jnp.sum(v, axis=0, keepdims=True)               # (S, D)

    # residual + FFN + residual + norm2
    x1 = x + attn
    hf = jnp.maximum(jnp.dot(x1, w_in, preferred_element_type=jnp.float32) + b_in, 0.0)
    ff = jnp.dot(hf, w_out, preferred_element_type=jnp.float32) + bo
    o_ref[0] = layernorm(x1 + ff, n2g, n2b)


# ----------------------------------------------------------------------------
# Host-side packing of parameters / constants for the fused kernel
# ----------------------------------------------------------------------------
def pack_params(params, cayley):
    D = cayley.shape[0]
    S = int(params["pe"].shape[0])
    layers = params["layers"]
    L = len(layers)
    H = int(np.asarray(layers[0]["w1a"]).shape[1])
    SS, DD, SD = S * S, D * D, S * D

    # embedding: zero-pad Linear(3 -> D) to (D, D); fold emb bias into the PE
    w_emb = np.zeros((D, D), np.float32)
    w_emb[:3, :] = np.asarray(params["emb_w"])
    pe_b = np.asarray(params["pe"]) + np.asarray(params["emb_b"])
    emb = np.concatenate([w_emb, pe_b], axis=0)                  # (D + S, D)

    # constant 0/1 selector matrices
    eye_s = np.eye(S, dtype=np.float32)
    eye_d = np.eye(D, dtype=np.float32)
    rep_row_q = np.repeat(eye_s, S, axis=0)                      # (S*S, S)
    tile_row_k = np.tile(eye_s, (S, 1))                          # (S*S, S)
    sum_over_i = np.tile(eye_d, (D, 1))                          # (D*D, D)
    rep_row_m = np.repeat(eye_s, D, axis=0)                      # (S*D, S)
    blk_eye = np.tile(eye_d, (S, 1))                             # (S*D, D)
    cay_l_ij = np.transpose(np.asarray(cayley, np.float32),
                            (2, 0, 1)).reshape(D, D * D)         # (D, D*D)
    rep_col_i = np.repeat(eye_d, D, axis=1)                      # (D, D*D)
    sum_over_k = np.repeat(eye_s, S, axis=1)                     # (S, S*S)

    def pack_rows(mats, width):
        out = np.zeros((sum(m.shape[0] for m in mats), width), np.float32)
        r = 0
        for m in mats:
            out[r:r + m.shape[0], :m.shape[1]] = m
            r += m.shape[0]
        return out

    sel_t = pack_rows([rep_row_q, tile_row_k, sum_over_i, rep_row_m, blk_eye],
                      max(S, D))
    sel_w = pack_rows([cay_l_ij, rep_col_i, sum_over_k], max(DD, SS))

    # per-layer packs (stacked along a leading layer axis)
    n_md = D + H + 2 * S + 9
    wqk = np.zeros((L, 2, S, SD), np.float32)
    wdh = np.zeros((L, 2, D, H), np.float32)
    md = np.zeros((L, n_md, D), np.float32)
    vh = np.zeros((L, 3, H), np.float32)
    for li, p in enumerate(layers):
        wqk[li, 0] = np.asarray(p["wq"]).reshape(S, SD)          # [(n), (m, i)]
        wqk[li, 1] = np.asarray(p["wk"]).reshape(S, SD)
        wdh[li, 0] = np.asarray(p["w1a"])
        wdh[li, 1] = np.asarray(p["win"])
        md[li, 0:D] = np.asarray(p["wv"])
        md[li, D:D + H] = np.asarray(p["wout"])
        md[li, D + H:D + H + S] = np.asarray(p["bq"])
        md[li, D + H + S:D + H + 2 * S] = np.asarray(p["bk"])
        vr = D + H + 2 * S
        for kk, name in enumerate(["norm1_g", "norm1_b", "gp_g", "gp_b",
                                   "bv", "bout", "norm2_g", "norm2_b"]):
            md[li, vr + kk] = np.asarray(p[name])[0]
        md[li, vr + 8, :] = float(np.asarray(p["b2a"])[0, 0])
        vh[li, 0] = np.asarray(p["b1a"])[0]
        vh[li, 1] = np.asarray(p["bin"])[0]
        vh[li, 2] = np.asarray(p["w2a"])[:, 0]

    return {
        "D": D, "S": S, "H": H, "L": L,
        "emb": jnp.asarray(emb),
        "sel_t": jnp.asarray(sel_t),
        "sel_w": jnp.asarray(sel_w),
        # wq/wk dominate HBM traffic -> bf16 (they only feed a softmax whose
        # row-sum reaches the output, so the output is unaffected)
        "wqk": jnp.asarray(wqk).astype(jnp.bfloat16),
        "wdh": jnp.asarray(wdh),
        "md": jnp.asarray(md),
        "vh": jnp.asarray(vh),
    }


def mvformer_forward(src, packed):
    """MVFormer.forward with num_decoder_layers == 0 => TransformerEncoderGA(src)."""
    B, S, C = src.shape
    D, H, L = packed["D"], packed["H"], packed["L"]
    n_md = packed["md"].shape[1]
    src_pad = jnp.zeros((B, S, D), jnp.float32).at[:, :, :C].set(src)

    # NOTE: at these toy shapes the whole working set is a few tens of KiB, far
    # below every generation's VMEM limit; at larger S, wq/wk should be tiled
    # over their output-row axis (v7x 64 MiB / v5e 16 MiB scoped-VMEM budgets).
    return pl.pallas_call(
        mvformer_kernel,
        out_shape=jax.ShapeDtypeStruct((B, S, D), jnp.float32),
        grid=(B, L),
        in_specs=[
            pl.BlockSpec((1, S, D), lambda b, l: (b, 0, 0)),             # src
            pl.BlockSpec((D + S, D), lambda b, l: (0, 0)),               # emb + pe
            pl.BlockSpec(packed["sel_t"].shape, lambda b, l: (0, 0)),    # selectors
            pl.BlockSpec(packed["sel_w"].shape, lambda b, l: (0, 0)),
            pl.BlockSpec((1, 2, S, S * D), lambda b, l: (l, 0, 0, 0)),   # wq/wk bf16
            pl.BlockSpec((1, 2, D, H), lambda b, l: (l, 0, 0, 0)),       # w1a / fc_in
            pl.BlockSpec((1, n_md, D), lambda b, l: (l, 0, 0)),          # D-col pack
            pl.BlockSpec((1, 3, H), lambda b, l: (l, 0, 0)),             # H-vec pack
        ],
        out_specs=pl.BlockSpec((1, S, D), lambda b, l: (b, 0, 0)),
        compiler_params=pltpu.CompilerParams(
            dimension_semantics=("parallel", "arbitrary")),
    )(src_pad, packed["emb"], packed["sel_t"], packed["sel_w"],
      packed["wqk"], packed["wdh"], packed["md"], packed["vh"])


# ----------------------------------------------------------------------------
# Pure-JAX reference (faithful math, used for a sanity check)
# ----------------------------------------------------------------------------
def _ln_ref(v, g, b):
    mu = v.mean(-1, keepdims=True)
    var = ((v - mu) ** 2).mean(-1, keepdims=True)
    return (v - mu) / jnp.sqrt(var + 1e-5) * g + b


def encoder_layer_ref(x, p, cay):
    xn = _ln_ref(x, p["norm1_g"], p["norm1_b"])
    v = xn @ p["wv"] + p["bv"][0]
    q_lin = jnp.einsum("bmi,nmi->bni", xn, p["wq"]) + p["bq"]
    k_lin = jnp.einsum("bmi,nmi->bni", xn, p["wk"]) + p["bk"]
    Q = _ln_ref(q_lin, p["gp_g"], p["gp_b"])
    K = _ln_ref(k_lin, p["gp_g"], p["gp_b"])
    gp = jnp.einsum("bqi,ijl,bkl->bqkj", Q, cay, K)
    h = jax.nn.relu(gp @ p["w1a"] + p["b1a"][0])
    scores = (h @ p["w2a"])[..., 0] + p["b2a"][0, 0]
    probs = jax.nn.softmax(scores, axis=-1)
    attn = jnp.einsum("bqk,bvd->bqd", probs, v)
    x = x + attn
    ff = jax.nn.relu(x @ p["win"] + p["bin"][0]) @ p["wout"] + p["bout"][0]
    x = x + ff
    return _ln_ref(x, p["norm2_g"], p["norm2_b"])


def mvformer_ref(src, params, cayley):
    x = src @ params["emb_w"] + params["emb_b"] + params["pe"]
    cay = jnp.asarray(cayley)
    for p in params["layers"]:
        x = encoder_layer_ref(x, p, cay)
    return x


# ----------------------------------------------------------------------------
# Deterministic parameter init (shapes follow the module's __init__)
# ----------------------------------------------------------------------------
def init_params(key, algebra_dim, embed_dim, hidden_dim, num_layers, seq_length):
    D = 2 ** algebra_dim
    assert embed_dim == D, "model requires embed_dim == 2**algebra_dim"
    S, H = seq_length, hidden_dim
    n_sub = algebra_dim + 1
    sub_sizes = [math.comb(algebra_dim, g) for g in range(n_sub)]

    def nrm(k, shape, scale):
        return (scale * jax.random.normal(k, shape)).astype(jnp.float32)

    keys = jax.random.split(key, 2 + num_layers)
    params = {
        "emb_w": nrm(keys[0], (3, D), 1.0 / math.sqrt(3.0)),
        "emb_b": nrm(keys[1], (1, D), 0.02),
        "pe": jnp.asarray(build_pe(S, D)),
        "layers": [],
    }
    for li in range(num_layers):
        ks = jax.random.split(keys[2 + li], 16)
        wq_sub = np.asarray(nrm(ks[0], (S, S, n_sub), 1.0 / S))
        wk_sub = np.asarray(nrm(ks[1], (S, S, n_sub), 1.0 / S))
        wq = jnp.asarray(np.repeat(wq_sub, sub_sizes, axis=-1))   # (S, S, D)
        wk = jnp.asarray(np.repeat(wk_sub, sub_sizes, axis=-1))
        bq = np.zeros((S, D), np.float32)
        bq[:, 0] = np.asarray(nrm(ks[2], (S,), 0.1))   # MVLinear bias on grade-0 only
        bk = np.zeros((S, D), np.float32)
        bk[:, 0] = np.asarray(nrm(ks[3], (S,), 0.1))
        params["layers"].append({
            "norm1_g": jnp.ones((1, D), jnp.float32), "norm1_b": jnp.zeros((1, D), jnp.float32),
            "wq": wq, "bq": jnp.asarray(bq),
            "wk": wk, "bk": jnp.asarray(bk),
            "gp_g": jnp.ones((1, D), jnp.float32), "gp_b": jnp.zeros((1, D), jnp.float32),
            "w1a": nrm(ks[4], (D, H), 1.0 / math.sqrt(D)), "b1a": nrm(ks[5], (1, H), 0.02),
            "w2a": nrm(ks[6], (H, 1), 1.0 / math.sqrt(H)), "b2a": nrm(ks[7], (1, 1), 0.02),
            "wv": nrm(ks[8], (D, D), 1.0 / math.sqrt(D)), "bv": nrm(ks[9], (1, D), 0.02),
            "win": nrm(ks[10], (D, H), 1.0 / math.sqrt(D)), "bin": nrm(ks[11], (1, H), 0.02),
            "wout": nrm(ks[12], (H, D), 1.0 / math.sqrt(H)), "bout": nrm(ks[13], (1, D), 0.02),
            "norm2_g": jnp.ones((1, D), jnp.float32), "norm2_b": jnp.zeros((1, D), jnp.float32),
        })
    return params


# ----------------------------------------------------------------------------
if __name__ == "__main__":
    algebra_dim = 3
    embed_dim = 8              # == 2**algebra_dim (required by the module)
    hidden_dim = 32
    num_encoder_layers = 2
    num_decoder_layers = 0     # encoder-only (decoder path unreachable in reference)
    seq_length = 8
    batch = 2

    key = jax.random.PRNGKey(0)
    pkey, xkey = jax.random.split(key)
    params = init_params(pkey, algebra_dim, embed_dim, hidden_dim,
                         num_encoder_layers, seq_length)
    cayley = build_cayley(algebra_dim)
    packed = pack_params(params, cayley)

    src = jax.random.normal(xkey, (batch, seq_length, 3), dtype=jnp.float32)

    out = jax.block_until_ready(mvformer_forward(src, packed))

    # sanity check against a faithful pure-JAX reference
    # (tolerance covers bf16 wq/wk storage + approximate EUP reciprocal)
    ref = mvformer_ref(src, params, cayley)
    np.testing.assert_allclose(np.asarray(out), np.asarray(ref), rtol=2e-2, atol=2e-2)

    print("KERNEL_OK")
</pallas_src>

<mosaic_0001>
module attributes {stable_mosaic.version = 11 : i64} {
  func.func @mvformer_kernel(%arg0: i32, %arg1: i32, %arg2: memref<1x8x8xf32, #tpu.memory_space<vmem>>, %arg3: memref<16x8xf32, #tpu.memory_space<vmem>>, %arg4: memref<320x8xf32, #tpu.memory_space<vmem>>, %arg5: memref<24x64xf32, #tpu.memory_space<vmem>>, %arg6: memref<1x2x8x64xbf16, #tpu.memory_space<vmem>>, %arg7: memref<1x2x8x32xf32, #tpu.memory_space<vmem>>, %arg8: memref<1x65x8xf32, #tpu.memory_space<vmem>>, %arg9: memref<1x3x32xf32, #tpu.memory_space<vmem>>, %arg10: memref<1x8x8xf32, #tpu.memory_space<vmem>>) attributes {dimension_semantics = [#tpu.dimension_semantics<parallel>, #tpu.dimension_semantics<arbitrary>], iteration_bounds = array<i64: 2, 2>, scalar_prefetch = 0 : i64, scratch_operands = 0 : i64, tpu.core_type = #tpu.core_type<tc>, window_params = [{transform_indices = @transform_0, window_bounds = array<i64: 1, 8, 8>}, {pipeline_mode = #tpu.pipeline_mode<synchronous>, transform_indices = @transform_1, window_bounds = array<i64: 16, 8>}, {pipeline_mode = #tpu.pipeline_mode<synchronous>, transform_indices = @transform_2, window_bounds = array<i64: 320, 8>}, {pipeline_mode = #tpu.pipeline_mode<synchronous>, transform_indices = @transform_3, window_bounds = array<i64: 24, 64>}, {transform_indices = @transform_4, window_bounds = array<i64: 1, 2, 8, 64>}, {transform_indices = @transform_5, window_bounds = array<i64: 1, 2, 8, 32>}, {transform_indices = @transform_6, window_bounds = array<i64: 1, 65, 8>}, {transform_indices = @transform_7, window_bounds = array<i64: 1, 3, 32>}, {transform_indices = @transform_8, window_bounds = array<i64: 1, 8, 8>}]} {
    %c0 = arith.constant 0 : index
    %c0_0 = arith.constant 0 : index
    %0 = vector.load %arg4[%c0, %c0_0] : memref<320x8xf32, #tpu.memory_space<vmem>>, vector<320x8xf32>
    %1 = vector.extract_strided_slice %0 {offsets = [0, 0], sizes = [64, 8], strides = [1, 1]} : vector<320x8xf32> to vector<64x8xf32>
    %2 = vector.extract_strided_slice %0 {offsets = [64, 0], sizes = [64, 8], strides = [1, 1]} : vector<320x8xf32> to vector<64x8xf32>
    %3 = vector.extract_strided_slice %0 {offsets = [128, 0], sizes = [64, 8], strides = [1, 1]} : vector<320x8xf32> to vector<64x8xf32>
    %4 = vector.extract_strided_slice %0 {offsets = [192, 0], sizes = [64, 8], strides = [1, 1]} : vector<320x8xf32> to vector<64x8xf32>
    %5 = vector.extract_strided_slice %0 {offsets = [256, 0], sizes = [64, 8], strides = [1, 1]} : vector<320x8xf32> to vector<64x8xf32>
    %c0_1 = arith.constant 0 : index
    %c0_2 = arith.constant 0 : index
    %6 = vector.load %arg5[%c0_1, %c0_2] : memref<24x64xf32, #tpu.memory_space<vmem>>, vector<24x64xf32>
    %7 = vector.extract_strided_slice %6 {offsets = [0, 0], sizes = [8, 64], strides = [1, 1]} : vector<24x64xf32> to vector<8x64xf32>
    %8 = vector.extract_strided_slice %6 {offsets = [8, 0], sizes = [8, 64], strides = [1, 1]} : vector<24x64xf32> to vector<8x64xf32>
    %9 = vector.extract_strided_slice %6 {offsets = [16, 0], sizes = [8, 64], strides = [1, 1]} : vector<24x64xf32> to vector<8x64xf32>
    %c0_3 = arith.constant 0 : index
    %c0_4 = arith.constant 0 : index
    %c0_5 = arith.constant 0 : index
    %c0_6 = arith.constant 0 : index
    %10 = vector.load %arg6[%c0_3, %c0_4, %c0_5, %c0_6] : memref<1x2x8x64xbf16, #tpu.memory_space<vmem>>, vector<1x2x8x64xbf16>
    %11 = vector.shape_cast %10 : vector<1x2x8x64xbf16> to vector<2x8x64xbf16>
    %c0_7 = arith.constant 0 : index
    %c0_8 = arith.constant 0 : index
    %c0_9 = arith.constant 0 : index
    %c0_10 = arith.constant 0 : index
    %12 = vector.load %arg7[%c0_7, %c0_8, %c0_9, %c0_10] : memref<1x2x8x32xf32, #tpu.memory_space<vmem>>, vector<1x2x8x32xf32>
    %13 = vector.shape_cast %12 : vector<1x2x8x32xf32> to vector<2x8x32xf32>
    %c0_11 = arith.constant 0 : index
    %c0_12 = arith.constant 0 : index
    %c0_13 = arith.constant 0 : index
    %14 = vector.load %arg8[%c0_11, %c0_12, %c0_13] : memref<1x65x8xf32, #tpu.memory_space<vmem>>, vector<1x65x8xf32>
    %15 = vector.shape_cast %14 : vector<1x65x8xf32> to vector<65x8xf32>
    %c0_14 = arith.constant 0 : index
    %c0_15 = arith.constant 0 : index
    %c0_16 = arith.constant 0 : index
    %16 = vector.load %arg9[%c0_14, %c0_15, %c0_16] : memref<1x3x32xf32, #tpu.memory_space<vmem>>, vector<1x3x32xf32>
    %17 = vector.shape_cast %16 : vector<1x3x32xf32> to vector<3x32xf32>
    %18 = vector.extract_strided_slice %13 {offsets = [0, 0, 0], sizes = [1, 8, 32], strides = [1, 1, 1]} : vector<2x8x32xf32> to vector<1x8x32xf32>
    %19 = vector.shape_cast %18 : vector<1x8x32xf32> to vector<8x32xf32>
    %20 = vector.extract_strided_slice %13 {offsets = [1, 0, 0], sizes = [1, 8, 32], strides = [1, 1, 1]} : vector<2x8x32xf32> to vector<1x8x32xf32>
    %21 = vector.shape_cast %20 : vector<1x8x32xf32> to vector<8x32xf32>
    %22 = vector.extract_strided_slice %15 {offsets = [0, 0], sizes = [8, 8], strides = [1, 1]} : vector<65x8xf32> to vector<8x8xf32>
    %23 = vector.extract_strided_slice %15 {offsets = [8, 0], sizes = [32, 8], strides = [1, 1]} : vector<65x8xf32> to vector<32x8xf32>
    %24 = vector.extract_strided_slice %15 {offsets = [40, 0], sizes = [8, 8], strides = [1, 1]} : vector<65x8xf32> to vector<8x8xf32>
    %25 = vector.extract_strided_slice %15 {offsets = [48, 0], sizes = [8, 8], strides = [1, 1]} : vector<65x8xf32> to vector<8x8xf32>
    %26 = vector.extract_strided_slice %15 {offsets = [56, 0], sizes = [1, 8], strides = [1, 1]} : vector<65x8xf32> to vector<1x8xf32>
    %27 = vector.extract_strided_slice %15 {offsets = [57, 0], sizes = [1, 8], strides = [1, 1]} : vector<65x8xf32> to vector<1x8xf32>
    %28 = vector.extract_strided_slice %15 {offsets = [58, 0], sizes = [1, 8], strides = [1, 1]} : vector<65x8xf32> to vector<1x8xf32>
    %29 = vector.extract_strided_slice %15 {offsets = [59, 0], sizes = [1, 8], strides = [1, 1]} : vector<65x8xf32> to vector<1x8xf32>
    %30 = vector.extract_strided_slice %15 {offsets = [60, 0], sizes = [1, 8], strides = [1, 1]} : vector<65x8xf32> to vector<1x8xf32>
    %31 = vector.extract_strided_slice %15 {offsets = [61, 0], sizes = [1, 8], strides = [1, 1]} : vector<65x8xf32> to vector<1x8xf32>
    %32 = vector.extract_strided_slice %15 {offsets = [62, 0], sizes = [1, 8], strides = [1, 1]} : vector<65x8xf32> to vector<1x8xf32>
    %33 = vector.extract_strided_slice %15 {offsets = [63, 0], sizes = [1, 8], strides = [1, 1]} : vector<65x8xf32> to vector<1x8xf32>
    %34 = vector.extract_strided_slice %15 {offsets = [64, 0], sizes = [1, 1], strides = [1, 1]} : vector<65x8xf32> to vector<1x1xf32>
    %35 = vector.extract_strided_slice %17 {offsets = [0, 0], sizes = [1, 32], strides = [1, 1]} : vector<3x32xf32> to vector<1x32xf32>
    %36 = vector.extract_strided_slice %17 {offsets = [1, 0], sizes = [1, 32], strides = [1, 1]} : vector<3x32xf32> to vector<1x32xf32>
    %37 = vector.extract_strided_slice %17 {offsets = [2, 0], sizes = [1, 32], strides = [1, 1]} : vector<3x32xf32> to vector<1x32xf32>
    %c0_i32 = arith.constant 0 : i32
    %38 = arith.cmpi eq, %arg1, %c0_i32 : i32
    %39 = arith.extui %38 : i1 to i32
    %c0_i32_17 = arith.constant 0 : i32
    %40 = arith.cmpi ne, %39, %c0_i32_17 : i32
    scf.if %40 {
      %c0_61 = arith.constant 0 : index
      %c0_62 = arith.constant 0 : index
      %188 = vector.load %arg3[%c0_61, %c0_62] : memref<16x8xf32, #tpu.memory_space<vmem>>, vector<16x8xf32>
      %c0_63 = arith.constant 0 : index
      %c0_64 = arith.constant 0 : index
      %c0_65 = arith.constant 0 : index
      %189 = vector.load %arg2[%c0_63, %c0_64, %c0_65] : memref<1x8x8xf32, #tpu.memory_space<vmem>>, vector<1x8x8xf32>
      %190 = vector.shape_cast %189 : vector<1x8x8xf32> to vector<8x8xf32>
      %191 = vector.extract_strided_slice %188 {offsets = [0, 0], sizes = [8, 8], strides = [1, 1]} : vector<16x8xf32> to vector<8x8xf32>
      %cst_66 = arith.constant dense<0.000000e+00> : vector<8x8xf32>
      %192 = tpu.matmul %190, %191, %cst_66 {dimension_numbers = #tpu.dot_dimension_numbers<[1], [0], [0], [1], [0, 0, 1, 1], [], []>} : vector<8x8xf32>, vector<8x8xf32>, vector<8x8xf32> -> vector<8x8xf32>
      %193 = vector.extract_strided_slice %188 {offsets = [8, 0], sizes = [8, 8], strides = [1, 1]} : vector<16x8xf32> to vector<8x8xf32>
      %194 = arith.addf %192, %193 : vector<8x8xf32>
      %c0_67 = arith.constant 0 : index
      %c0_68 = arith.constant 0 : index
      %c0_69 = arith.constant 0 : index
      %195 = vector.load %arg10[%c0_67, %c0_68, %c0_69] : memref<1x8x8xf32, #tpu.memory_space<vmem>>, vector<1x8x8xf32>
      %196 = vector.shape_cast %195 : vector<1x8x8xf32> to vector<8x8xf32>
      %197 = vector.shape_cast %194 : vector<8x8xf32> to vector<1x8x8xf32>
      tpu.vector_store %arg10[%c0_67, %c0_68, %c0_69], %197 {strides = array<i32>} : memref<1x8x8xf32, #tpu.memory_space<vmem>>, vector<1x8x8xf32>,
    } else {
    }
    %c0_18 = arith.constant 0 : index
    %c0_19 = arith.constant 0 : index
    %c0_20 = arith.constant 0 : index
    %41 = vector.load %arg10[%c0_18, %c0_19, %c0_20] : memref<1x8x8xf32, #tpu.memory_space<vmem>>, vector<1x8x8xf32>
    %42 = vector.shape_cast %41 : vector<1x8x8xf32> to vector<8x8xf32>
    %cst = arith.constant dense<0.000000e+00> : vector<8xf32>
    %43 = vector.multi_reduction <add>, %42, %cst [1] : vector<8x8xf32> to vector<8xf32>
    %44 = vector.shape_cast %43 : vector<8xf32> to vector<8x1xf32>
    %cst_21 = arith.constant 8.000000e+00 : f32
    %45 = vector.broadcast %cst_21 : f32 to vector<8x1xf32>
    %46 = arith.divf %44, %45 : vector<8x1xf32>
    %47 = vector.broadcast %46 : vector<8x1xf32> to vector<8x8xf32>
    %48 = arith.subf %42, %47 : vector<8x8xf32>
    %49 = arith.mulf %48, %48 : vector<8x8xf32>
    %cst_22 = arith.constant dense<0.000000e+00> : vector<8xf32>
    %50 = vector.multi_reduction <add>, %49, %cst_22 [1] : vector<8x8xf32> to vector<8xf32>
    %51 = vector.shape_cast %50 : vector<8xf32> to vector<8x1xf32>
    %cst_23 = arith.constant 8.000000e+00 : f32
    %52 = vector.broadcast %cst_23 : f32 to vector<8x1xf32>
    %53 = arith.divf %51, %52 : vector<8x1xf32>
    %54 = vector.broadcast %46 : vector<8x1xf32> to vector<8x8xf32>
    %55 = arith.subf %42, %54 : vector<8x8xf32>
    %cst_24 = arith.constant 9.99999974E-6 : f32
    %56 = vector.broadcast %cst_24 : f32 to vector<8x1xf32>
    %57 = arith.addf %53, %56 : vector<8x1xf32>
    %58 = math.rsqrt %57 : vector<8x1xf32>
    %59 = vector.broadcast %58 : vector<8x1xf32> to vector<8x8xf32>
    %60 = arith.mulf %55, %59 : vector<8x8xf32>
    %61 = vector.broadcast %26 : vector<1x8xf32> to vector<8x8xf32>
    %62 = arith.mulf %60, %61 : vector<8x8xf32>
    %63 = vector.broadcast %27 : vector<1x8xf32> to vector<8x8xf32>
    %64 = arith.addf %62, %63 : vector<8x8xf32>
    %cst_25 = arith.constant dense<0.000000e+00> : vector<8x8xf32>
    %65 = tpu.matmul %64, %22, %cst_25 {dimension_numbers = #tpu.dot_dimension_numbers<[1], [0], [0], [1], [0, 0, 1, 1], [], []>} : vector<8x8xf32>, vector<8x8xf32>, vector<8x8xf32> -> vector<8x8xf32>
    %66 = vector.broadcast %30 : vector<1x8xf32> to vector<8x8xf32>
    %67 = arith.addf %65, %66 : vector<8x8xf32>
    %cst_26 = arith.constant dense<0.000000e+00> : vector<64x8xf32>
    %68 = tpu.matmul %4, %64, %cst_26 {dimension_numbers = #tpu.dot_dimension_numbers<[1], [0], [0], [1], [0, 0, 1, 1], [], []>} : vector<64x8xf32>, vector<8x8xf32>, vector<64x8xf32> -> vector<64x8xf32>
    %69 = arith.mulf %68, %5 : vector<64x8xf32>
    %70 = arith.truncf %69 : vector<64x8xf32> to vector<64x8xbf16>
    %71 = vector.extract_strided_slice %11 {offsets = [0, 0, 0], sizes = [1, 8, 64], strides = [1, 1, 1]} : vector<2x8x64xbf16> to vector<1x8x64xbf16>
    %72 = vector.shape_cast %71 : vector<1x8x64xbf16> to vector<8x64xbf16>
    %cst_27 = arith.constant dense<0.000000e+00> : vector<8x8xf32>
    %73 = tpu.matmul %72, %70, %cst_27 {dimension_numbers = #tpu.dot_dimension_numbers<[1], [0], [0], [1], [0, 0, 1, 1], [], []>} : vector<8x64xbf16>, vector<64x8xbf16>, vector<8x8xf32> -> vector<8x8xf32>
    %74 = arith.addf %73, %24 : vector<8x8xf32>
    %75 = vector.extract_strided_slice %11 {offsets = [1, 0, 0], sizes = [1, 8, 64], strides = [1, 1, 1]} : vector<2x8x64xbf16> to vector<1x8x64xbf16>
    %76 = vector.shape_cast %75 : vector<1x8x64xbf16> to vector<8x64xbf16>
    %cst_28 = arith.constant dense<0.000000e+00> : vector<8x8xf32>
    %77 = tpu.matmul %76, %70, %cst_28 {dimension_numbers = #tpu.dot_dimension_numbers<[1], [0], [0], [1], [0, 0, 1, 1], [], []>} : vector<8x64xbf16>, vector<64x8xbf16>, vector<8x8xf32> -> vector<8x8xf32>
    %78 = arith.addf %77, %25 : vector<8x8xf32>
    %cst_29 = arith.constant dense<0.000000e+00> : vector<8xf32>
    %79 = vector.multi_reduction <add>, %74, %cst_29 [1] : vector<8x8xf32> to vector<8xf32>
    %80 = vector.shape_cast %79 : vector<8xf32> to vector<8x1xf32>
    %cst_30 = arith.constant 8.000000e+00 : f32
    %81 = vector.broadcast %cst_30 : f32 to vector<8x1xf32>
    %82 = arith.divf %80, %81 : vector<8x1xf32>
    %83 = vector.broadcast %82 : vector<8x1xf32> to vector<8x8xf32>
    %84 = arith.subf %74, %83 : vector<8x8xf32>
    %85 = arith.mulf %84, %84 : vector<8x8xf32>
    %cst_31 = arith.constant dense<0.000000e+00> : vector<8xf32>
    %86 = vector.multi_reduction <add>, %85, %cst_31 [1] : vector<8x8xf32> to vector<8xf32>
    %87 = vector.shape_cast %86 : vector<8xf32> to vector<8x1xf32>
    %cst_32 = arith.constant 8.000000e+00 : f32
    %88 = vector.broadcast %cst_32 : f32 to vector<8x1xf32>
    %89 = arith.divf %87, %88 : vector<8x1xf32>
    %90 = vector.broadcast %82 : vector<8x1xf32> to vector<8x8xf32>
    %91 = arith.subf %74, %90 : vector<8x8xf32>
    %cst_33 = arith.constant 9.99999974E-6 : f32
    %92 = vector.broadcast %cst_33 : f32 to vector<8x1xf32>
    %93 = arith.addf %89, %92 : vector<8x1xf32>
    %94 = math.rsqrt %93 : vector<8x1xf32>
    %95 = vector.broadcast %94 : vector<8x1xf32> to vector<8x8xf32>
    %96 = arith.mulf %91, %95 : vector<8x8xf32>
    %97 = vector.broadcast %28 : vector<1x8xf32> to vector<8x8xf32>
    %98 = arith.mulf %96, %97 : vector<8x8xf32>
    %99 = vector.broadcast %29 : vector<1x8xf32> to vector<8x8xf32>
    %100 = arith.addf %98, %99 : vector<8x8xf32>
    %cst_34 = arith.constant dense<0.000000e+00> : vector<8xf32>
    %101 = vector.multi_reduction <add>, %78, %cst_34 [1] : vector<8x8xf32> to vector<8xf32>
    %102 = vector.shape_cast %101 : vector<8xf32> to vector<8x1xf32>
    %cst_35 = arith.constant 8.000000e+00 : f32
    %103 = vector.broadcast %cst_35 : f32 to vector<8x1xf32>
    %104 = arith.divf %102, %103 : vector<8x1xf32>
    %105 = vector.broadcast %104 : vector<8x1xf32> to vector<8x8xf32>
    %106 = arith.subf %78, %105 : vector<8x8xf32>
    %107 = arith.mulf %106, %106 : vector<8x8xf32>
    %cst_36 = arith.constant dense<0.000000e+00> : vector<8xf32>
    %108 = vector.multi_reduction <add>, %107, %cst_36 [1] : vector<8x8xf32> to vector<8xf32>
    %109 = vector.shape_cast %108 : vector<8xf32> to vector<8x1xf32>
    %cst_37 = arith.constant 8.000000e+00 : f32
    %110 = vector.broadcast %cst_37 : f32 to vector<8x1xf32>
    %111 = arith.divf %109, %110 : vector<8x1xf32>
    %112 = vector.broadcast %104 : vector<8x1xf32> to vector<8x8xf32>
    %113 = arith.subf %78, %112 : vector<8x8xf32>
    %cst_38 = arith.constant 9.99999974E-6 : f32
    %114 = vector.broadcast %cst_38 : f32 to vector<8x1xf32>
    %115 = arith.addf %111, %114 : vector<8x1xf32>
    %116 = math.rsqrt %115 : vector<8x1xf32>
    %117 = vector.broadcast %116 : vector<8x1xf32> to vector<8x8xf32>
    %118 = arith.mulf %113, %117 : vector<8x8xf32>
    %119 = vector.broadcast %28 : vector<1x8xf32> to vector<8x8xf32>
    %120 = arith.mulf %118, %119 : vector<8x8xf32>
    %121 = vector.broadcast %29 : vector<1x8xf32> to vector<8x8xf32>
    %122 = arith.addf %120, %121 : vector<8x8xf32>
    %cst_39 = arith.constant dense<0.000000e+00> : vector<8x64xf32>
    %123 = tpu.matmul %122, %7, %cst_39 {dimension_numbers = #tpu.dot_dimension_numbers<[1], [0], [0], [1], [0, 0, 1, 1], [], []>} : vector<8x8xf32>, vector<8x64xf32>, vector<8x64xf32> -> vector<8x64xf32>
    %cst_40 = arith.constant dense<0.000000e+00> : vector<64x64xf32>
    %124 = tpu.matmul %2, %123, %cst_40 {dimension_numbers = #tpu.dot_dimension_numbers<[1], [0], [0], [1], [0, 0, 1, 1], [], []>} : vector<64x8xf32>, vector<8x64xf32>, vector<64x64xf32> -> vector<64x64xf32>
    %cst_41 = arith.constant dense<0.000000e+00> : vector<8x64xf32>
    %125 = tpu.matmul %100, %8, %cst_41 {dimension_numbers = #tpu.dot_dimension_numbers<[1], [0], [0], [1], [0, 0, 1, 1], [], []>} : vector<8x8xf32>, vector<8x64xf32>, vector<8x64xf32> -> vector<8x64xf32>
    %cst_42 = arith.constant dense<0.000000e+00> : vector<64x64xf32>
    %126 = tpu.matmul %1, %125, %cst_42 {dimension_numbers = #tpu.dot_dimension_numbers<[1], [0], [0], [1], [0, 0, 1, 1], [], []>} : vector<64x8xf32>, vector<8x64xf32>, vector<64x64xf32> -> vector<64x64xf32>
    %127 = arith.mulf %126, %124 : vector<64x64xf32>
    %cst_43 = arith.constant dense<0.000000e+00> : vector<64x8xf32>
    %128 = tpu.matmul %127, %3, %cst_43 {dimension_numbers = #tpu.dot_dimension_numbers<[1], [0], [0], [1], [0, 0, 1, 1], [], []>} : vector<64x64xf32>, vector<64x8xf32>, vector<64x8xf32> -> vector<64x8xf32>
    %cst_44 = arith.constant dense<0.000000e+00> : vector<64x32xf32>
    %129 = tpu.matmul %128, %19, %cst_44 {dimension_numbers = #tpu.dot_dimension_numbers<[1], [0], [0], [1], [0, 0, 1, 1], [], []>} : vector<64x8xf32>, vector<8x32xf32>, vector<64x32xf32> -> vector<64x32xf32>
    %130 = vector.broadcast %35 : vector<1x32xf32> to vector<64x32xf32>
    %131 = arith.addf %129, %130 : vector<64x32xf32>
    %cst_45 = arith.constant 0.000000e+00 : f32
    %132 = vector.broadcast %cst_45 : f32 to vector<64x32xf32>
    %133 = arith.maximumf %131, %132 : vector<64x32xf32>
    %134 = vector.broadcast %37 : vector<1x32xf32> to vector<64x32xf32>
    %135 = arith.mulf %133, %134 : vector<64x32xf32>
    %cst_46 = arith.constant dense<0.000000e+00> : vector<64xf32>
    %136 = vector.multi_reduction <add>, %135, %cst_46 [1] : vector<64x32xf32> to vector<64xf32>
    %137 = vector.shape_cast %136 : vector<64xf32> to vector<64x1xf32>
    %138 = vector.broadcast %34 : vector<1x1xf32> to vector<64x1xf32>
    %139 = arith.addf %137, %138 : vector<64x1xf32>
    %cst_47 = arith.constant dense<0xFF800000> : vector<1xf32>
    %140 = vector.multi_reduction <maximumf>, %139, %cst_47 [0] : vector<64x1xf32> to vector<1xf32>
    %141 = vector.shape_cast %140 : vector<1xf32> to vector<1x1xf32>
    %142 = vector.broadcast %141 : vector<1x1xf32> to vector<64x1xf32>
    %143 = arith.subf %139, %142 : vector<64x1xf32>
    %144 = math.exp %143 : vector<64x1xf32>
    %cst_48 = arith.constant dense<0.000000e+00> : vector<8x1xf32>
    %145 = tpu.matmul %9, %144, %cst_48 {dimension_numbers = #tpu.dot_dimension_numbers<[1], [0], [0], [1], [0, 0, 1, 1], [], []>} : vector<8x64xf32>, vector<64x1xf32>, vector<8x1xf32> -> vector<8x1xf32>
    %146 = tpu.reciprocal %145 {approx = true} : vector<8x1xf32> -> vector<8x1xf32>
    %147 = arith.mulf %145, %146 : vector<8x1xf32>
    %cst_49 = arith.constant dense<0.000000e+00> : vector<8xf32>
    %148 = vector.multi_reduction <add>, %67, %cst_49 [0] : vector<8x8xf32> to vector<8xf32>
    %149 = vector.shape_cast %148 : vector<8xf32> to vector<1x8xf32>
    %150 = vector.broadcast %147 : vector<8x1xf32> to vector<8x8xf32>
    %151 = vector.broadcast %149 : vector<1x8xf32> to vector<8x8xf32>
    %152 = arith.mulf %150, %151 : vector<8x8xf32>
    %153 = arith.addf %42, %152 : vector<8x8xf32>
    %cst_50 = arith.constant dense<0.000000e+00> : vector<8x32xf32>
    %154 = tpu.matmul %153, %21, %cst_50 {dimension_numbers = #tpu.dot_dimension_numbers<[1], [0], [0], [1], [0, 0, 1, 1], [], []>} : vector<8x8xf32>, vector<8x32xf32>, vector<8x32xf32> -> vector<8x32xf32>
    %155 = vector.broadcast %36 : vector<1x32xf32> to vector<8x32xf32>
    %156 = arith.addf %154, %155 : vector<8x32xf32>
    %cst_51 = arith.constant 0.000000e+00 : f32
    %157 = vector.broadcast %cst_51 : f32 to vector<8x32xf32>
    %158 = arith.maximumf %156, %157 : vector<8x32xf32>
    %cst_52 = arith.constant dense<0.000000e+00> : vector<8x8xf32>
    %159 = tpu.matmul %158, %23, %cst_52 {dimension_numbers = #tpu.dot_dimension_numbers<[1], [0], [0], [1], [0, 0, 1, 1], [], []>} : vector<8x32xf32>, vector<32x8xf32>, vector<8x8xf32> -> vector<8x8xf32>
    %160 = vector.broadcast %31 : vector<1x8xf32> to vector<8x8xf32>
    %161 = arith.addf %159, %160 : vector<8x8xf32>
    %162 = arith.addf %153, %161 : vector<8x8xf32>
    %cst_53 = arith.constant dense<0.000000e+00> : vector<8xf32>
    %163 = vector.multi_reduction <add>, %162, %cst_53 [1] : vector<8x8xf32> to vector<8xf32>
    %164 = vector.shape_cast %163 : vector<8xf32> to vector<8x1xf32>
    %cst_54 = arith.constant 8.000000e+00 : f32
    %165 = vector.broadcast %cst_54 : f32 to vector<8x1xf32>
    %166 = arith.divf %164, %165 : vector<8x1xf32>
    %167 = vector.broadcast %166 : vector<8x1xf32> to vector<8x8xf32>
    %168 = arith.subf %162, %167 : vector<8x8xf32>
    %169 = arith.mulf %168, %168 : vector<8x8xf32>
    %cst_55 = arith.constant dense<0.000000e+00> : vector<8xf32>
    %170 = vector.multi_reduction <add>, %169, %cst_55 [1] : vector<8x8xf32> to vector<8xf32>
    %171 = vector.shape_cast %170 : vector<8xf32> to vector<8x1xf32>
    %cst_56 = arith.constant 8.000000e+00 : f32
    %172 = vector.broadcast %cst_56 : f32 to vector<8x1xf32>
    %173 = arith.divf %171, %172 : vector<8x1xf32>
    %174 = vector.broadcast %166 : vector<8x1xf32> to vector<8x8xf32>
    %175 = arith.subf %162, %174 : vector<8x8xf32>
    %cst_57 = arith.constant 9.99999974E-6 : f32
    %176 = vector.broadcast %cst_57 : f32 to vector<8x1xf32>
    %177 = arith.addf %173, %176 : vector<8x1xf32>
    %178 = math.rsqrt %177 : vector<8x1xf32>
    %179 = vector.broadcast %178 : vector<8x1xf32> to vector<8x8xf32>
    %180 = arith.mulf %175, %179 : vector<8x8xf32>
    %181 = vector.broadcast %32 : vector<1x8xf32> to vector<8x8xf32>
    %182 = arith.mulf %180, %181 : vector<8x8xf32>
    %183 = vector.broadcast %33 : vector<1x8xf32> to vector<8x8xf32>
    %184 = arith.addf %182, %183 : vector<8x8xf32>
    %c0_58 = arith.constant 0 : index
    %c0_59 = arith.constant 0 : index
    %c0_60 = arith.constant 0 : index
    %185 = vector.load %arg10[%c0_58, %c0_59, %c0_60] : memref<1x8x8xf32, #tpu.memory_space<vmem>>, vector<1x8x8xf32>
    %186 = vector.shape_cast %185 : vector<1x8x8xf32> to vector<8x8xf32>
    %187 = vector.shape_cast %184 : vector<8x8xf32> to vector<1x8x8xf32>
    tpu.vector_store %arg10[%c0_58, %c0_59, %c0_60], %187 {strides = array<i32>} : memref<1x8x8xf32, #tpu.memory_space<vmem>>, vector<1x8x8xf32>,
    return
  }
  func.func @transform_0(%arg0: i32, %arg1: i32) -> (i32, i32, i32) {
    %c0_i32 = arith.constant 0 : i32
    %c0_i32_0 = arith.constant 0 : i32
    %c0_i32_1 = arith.constant 0 : i32
    return %arg0, %c0_i32, %c0_i32_0 : i32, i32, i32
  }
  func.func @transform_1(%arg0: i32, %arg1: i32) -> (i32, i32) {
    %c0_i32 = arith.constant 0 : i32
    %c0_i32_0 = arith.constant 0 : i32
    %c0_i32_1 = arith.constant 0 : i32
    return %c0_i32, %c0_i32_0 : i32, i32
  }
  func.func @transform_2(%arg0: i32, %arg1: i32) -> (i32, i32) {
    %c0_i32 = arith.constant 0 : i32
    %c0_i32_0 = arith.constant 0 : i32
    %c0_i32_1 = arith.constant 0 : i32
    return %c0_i32, %c0_i32_0 : i32, i32
  }
  func.func @transform_3(%arg0: i32, %arg1: i32) -> (i32, i32) {
    %c0_i32 = arith.constant 0 : i32
    %c0_i32_0 = arith.constant 0 : i32
    %c0_i32_1 = arith.constant 0 : i32
    return %c0_i32, %c0_i32_0 : i32, i32
  }
  func.func @transform_4(%arg0: i32, %arg1: i32) -> (i32, i32, i32, i32) {
    %c0_i32 = arith.constant 0 : i32
    %c0_i32_0 = arith.constant 0 : i32
    %c0_i32_1 = arith.constant 0 : i32
    %c0_i32_2 = arith.constant 0 : i32
    return %arg1, %c0_i32, %c0_i32_0, %c0_i32_1 : i32, i32, i32, i32
  }
  func.func @transform_5(%arg0: i32, %arg1: i32) -> (i32, i32, i32, i32) {
    %c0_i32 = arith.constant 0 : i32
    %c0_i32_0 = arith.constant 0 : i32
    %c0_i32_1 = arith.constant 0 : i32
    %c0_i32_2 = arith.constant 0 : i32
    return %arg1, %c0_i32, %c0_i32_0, %c0_i32_1 : i32, i32, i32, i32
  }
  func.func @transform_6(%arg0: i32, %arg1: i32) -> (i32, i32, i32) {
    %c0_i32 = arith.constant 0 : i32
    %c0_i32_0 = arith.constant 0 : i32
    %c0_i32_1 = arith.constant 0 : i32
    return %arg1, %c0_i32, %c0_i32_0 : i32, i32, i32
  }
  func.func @transform_7(%arg0: i32, %arg1: i32) -> (i32, i32, i32) {
    %c0_i32 = arith.constant 0 : i32
    %c0_i32_0 = arith.constant 0 : i32
    %c0_i32_1 = arith.constant 0 : i32
    return %arg1, %c0_i32, %c0_i32_0 : i32, i32, i32
  }
  func.func @transform_8(%arg0: i32, %arg1: i32) -> (i32, i32, i32) {
    %c0_i32 = arith.constant 0 : i32
    %c0_i32_0 = arith.constant 0 : i32
    %c0_i32_1 = arith.constant 0 : i32
    return %arg0, %c0_i32, %c0_i32_0 : i32, i32, i32
  }
}

</mosaic_0001>

<bundles_post_ra>
// kernel: tpu_custom_call.1
= control target key start
LH: loop header
LB: loop body
LE: loop exit
PB: predicated region body
PF: predicated region fallthrough
CT: control target
= control target key end

     0   :  { %s3270_s0 = inlined_call_operand.vmem [shape: f32[2,8,8], index: 0, kind: input, shape index: {}]   ;;  %s3271_s1 = inlined_call_operand.vmem [shape: f32[16,8], index: 1, kind: input, shape index: {}]   ;;  %s3272_s2 = inlined_call_operand.vmem [shape: f32[320,8], index: 2, kind: input, shape index: {}]   ;;  %s3273_s3 = inlined_call_operand.vmem [shape: f32[24,64], index: 3, kind: input, shape index: {}]   ;;  %s3274_s4 = inlined_call_operand.vmem [shape: bf16[2,2,8,64], index: 4, kind: input, shape index: {}]   ;;  %s3275_s5 = inlined_call_operand.vmem [shape: f32[2,2,8,32], index: 5, kind: input, shape index: {}]   ;;  %s3276_s6 = inlined_call_operand.vmem [shape: f32[2,65,8], index: 6, kind: input, shape index: {}]   ;;  %s3277_s7 = inlined_call_operand.vmem [shape: f32[2,3,32], index: 7, kind: input, shape index: {}]   ;;  %s3278_s8 = inlined_call_operand.hbm [shape: f32[2,8,8], index: 8, kind: output, shape index: {}]  }
   0x1   :  { %3290 = sst [smem:[#allocation18_spill]] %s3270_s0 }
   0x2   :  { %13 = vsyncpa [#allocation3], 0 }
   0x3   :  { %15 = vsyncpa [#allocation3 + $0x1], 0  ;;  %s2645_s27 = smov 0   ;;  %s2647_s28 = smov 0  }
   0x4   :  { %s2649_s29 = smov 0   ;;  %s2651_s30 = smov 0  }
   0x5   :  { %s2653_s9 = smov 0   ;;  %s2655_s10 = smov 0  }
   0x6   :  { %s2657_s11 = smov 0   ;;  %s2659_s12 = smov 0  }
   0x7 LB: > { %3291 = sst [smem:[#allocation5_spill]] %s2564_s27  ;;  %s2077_s13 = sadd.s32 4294967295, %s2592_s12   ;;  %s2592_s12 = sphi %s2659_s12, %s21_s12   ;;  %s2588_s11 = sphi %s2657_s11, %s3321_s11   ;;  %s2584_s10 = sphi %s2655_s10, %s3320_s10   ;;  %s2580_s9 = sphi %s2653_s9, %s3319_s9   ;;  %s2576_s30 = sphi %s2651_s30, %s3318_s30   ;;  %s2572_s29 = sphi %s2649_s29, %s3317_s29   ;;  %s2568_s28 = sphi %s2647_s28, %s3323_s28   ;;  %s2564_s27 = sphi %s2645_s27, %s3322_s27  }
   0x8   : > { %3292 = sst [smem:[#allocation6_spill]] %s2572_s29  ;;  %s2078_s14 = sadd.s32 4294967294, %s2592_s12  }
   0x9   : > { %3293 = sst [smem:[#allocation7_spill]] %s2584_s10  ;;  %s30_s15 = sadd.s32 1, %s2584_s10 }
   0xa   : > { %3294 = sst [smem:[#allocation8_spill]] %s2588_s11  ;;  %p31_p0 = scmp.ge.s32.totalorder %s30_s15, 2 }
   0xb   : > { %s33_s16 = sadd.s32 1, %s2588_s11  ;;  %p243_p1 = scmp.ne.s32.totalorder %s2572_s29, %s2568_s28 }
   0xc   : > { %p244_p2 = scmp.eq.s32.totalorder %s2077_s13, 3  ;;  %s3325_s15 = smov (%p31_p0, %s30_s15), 0 }
   0xd   : > { %3295 = sst [smem:[#allocation9_spill]] %s3325_s15  ;;  %s3327_s16 = smov (!%p31_p0, %s33_s16), %s2588_s11 }
   0xe   : > { %p2694_p3 = por %p244_p2, %p243_p1  ;;  %p249_p4 = scmp.ne.s32.totalorder %s2568_s28, %s2564_s27 }
   0xf   : > { %p35_p5 = scmp.ge.s32.totalorder %s3327_s16, 2  ;;  %p250_p6 = scmp.eq.s32.totalorder %s2078_s14, 3 }
  0x10   : > { %p2081_p7 = scmp.ge.s32.totalorder %s2592_s12, 1  ;;  %p315_p8 = scmp.lt.s32.totalorder %s2592_s12, 5 }
  0x11   : > { %s3329_s16 = smov (%p35_p5, %s3327_s16), 0  ;;  %p2704_p9 = por %p250_p6, %p249_p4 }
  0x12   : > { %3297 = sst [smem:[#allocation10_spill]] %s3329_s16  ;;  %p316_p10 = pnand %p2081_p7, %p315_p8 }
  0x13   : > { %s3298_s18 = scalar_select %p2704_p9, 1, 0 }
  0x14   : > { %s230_s19 = ssub.s32 %s2588_s11, %s3329_s16  ;;  %s233_s20 = sadd.s32 1, %s2572_s29 }
  0x15   : > { %3299 = sst [smem:[#allocation11_spill]] %s3298_s18  ;;  %p231_p11 = scmp.eq.s32.totalorder %s230_s19, 0 }
  0x16   : > { %319 = sbr.rel (%p316_p10) target bundleno = 3344 (0xd10), region = 52 }
  0x17   : > { %s2712_s21 = scalar_select %p231_p11, %s2572_s29, %s233_s20  }
  0x19   : > { %3300 = sst [smem:[#allocation12_spill]] %s2712_s21 }
  0x1b   : > { %s3280_s22 = sand.u32 1, %s2568_s28   ;;  %p367_p12 = scmp.lt.s32.totalorder %s2580_s9, 1  ;;  %v2719_v0 = vld [vmem:[%s3272_s2] sm:$0xff]  ;;  %v2724_v1 = vld [vmem:[%s3272_s2 + $0x8] sm:$0xff]  ;;  %v2729_v2 = vld [vmem:[%s3272_s2 + $0x10] sm:$0xff] }
  0x1c   : > { %s2733_s19 = sshll.u32 %s3280_s22, 3  ;;  %p371_p13 = scmp.lt.s32.totalorder %s2576_s30, 1  ;;  %v2739_v3 = vld [vmem:[%s3272_s2 + $0x18] sm:$0xff]  ;;  %v2744_v4 = vld [vmem:[%s3272_s2 + $0x20] sm:$0xff]  ;;  %v2749_v5 = vld [vmem:[%s3272_s2 + $0x28] sm:$0xff] }
  0x1d   : > { %v2754_v6 = vld [vmem:[%s3272_s2 + $0x30] sm:$0xff]  ;;  %v2759_v7 = vld [vmem:[%s3272_s2 + $0x38] sm:$0xff]  ;;  %v2764_v8 = vld [vmem:[%s3272_s2 + $0x40] sm:$0xff]  ;;  %s368_s23 = scalar_select %p367_p12, %s2580_s9, 1 }
  0x1e   : > { %v2770_v9 = vld [vmem:[%s3272_s2 + $0x48] sm:$0xff]  ;;  %v2775_v10 = vld [vmem:[%s3272_s2 + $0x50] sm:$0xff]  ;;  %v2780_v11 = vld [vmem:[%s3272_s2 + $0x58] sm:$0xff]  ;;  %s2783_s22 = scalar_select %p371_p13, %s2576_s30, 1 }
  0x1f   : > { %v2788_v12 = vld [vmem:[%s3272_s2 + $0x60] sm:$0xff]  ;;  %v2793_v13 = vld [vmem:[%s3272_s2 + $0x68] sm:$0xff]  ;;  %v2798_v14 = vld [vmem:[%s3272_s2 + $0x70] sm:$0xff]  ;;  %s2083_s14 = sshll.u32 %s368_s23, 3  ;;  %s3301_s0 = sld [smem:[#allocation18_spill]] }
  0x20   : > { %v2803_v15 = vld [vmem:[%s3272_s2 + $0x78] sm:$0xff]  ;;  %v2808_v16 = vld [vmem:[%s3272_s2 + $0x80] sm:$0xff]  ;;  %v2813_v17 = vld [vmem:[%s3272_s2 + $0x88] sm:$0xff]  ;;  %s2145_s24 = sshll.u32 %s2783_s22, 3  ;;  %s2146_s11 = sshll.u32 %s2783_s22, 4 }
  0x21   : > { %v2823_v18 = vld [vmem:[%s3272_s2 + $0x90] sm:$0xff]  ;;  %v2828_v19 = vld [vmem:[%s3272_s2 + $0x98] sm:$0xff]  ;;  %v2833_v20 = vld [vmem:[%s3272_s2 + $0xa0] sm:$0xff]  ;;  %s2396_s15 = smul.u32 72, %s2783_s22  ;;  %s375_s16 = scalar_lea.vmem %s3274_s4, %s2145_s24 }
  0x22   : > { %v2839_v21 = vld [vmem:[%s3272_s2 + $0xa8] sm:$0xff]  ;;  %v2844_v22 = vld [vmem:[%s3272_s2 + $0xb0] sm:$0xff]  ;;  %v2849_v23 = vld [vmem:[%s3272_s2 + $0xb8] sm:$0xff]  ;;  %s380_s25 = scalar_lea.vmem %s3275_s5, %s2146_s11  ;;  %s2089_s11 = sshll.u32 %s2783_s22, 2 }
  0x23   : > { %v415_v24 = vld [vmem:[%s3272_s2 + $0xc0] sm:$0xff]  ;;  %v2859_v25 = vld [vmem:[%s3272_s2 + $0xc8] sm:$0xff]  ;;  %v2864_v26 = vld [vmem:[%s3272_s2 + $0xd0] sm:$0xff]  ;;  %s385_s18 = scalar_lea.vmem %s3276_s6, %s2396_s15  ;;  %p2090_p0 = scmp.ne.s32.totalorder %s2576_s30, 0 }
  0x24   : > { %v2869_v27 = vld [vmem:[%s3272_s2 + $0xd8] sm:$0xff]  ;;  %v2874_v28 = vld [vmem:[%s3272_s2 + $0xe0] sm:$0xff]  ;;  %v2879_v29 = vld [vmem:[%s3272_s2 + $0xe8] sm:$0xff] }
  0x25   : > { %s2818_s13 = scalar_lea.vmem %s3301_s0, %s2083_s14  ;;  %v2884_v30 = vld [vmem:[%s3272_s2 + $0xf0] sm:$0xff]  ;;  %v2889_v31 = vld [vmem:[%s3272_s2 + $0xf8] sm:$0xff]  ;;  %v2894_v32 = vld [vmem:[%s3272_s2 + $0x100] sm:$0xff]  ;;  %s389_s14 = scalar_lea.vmem %s3277_s7, %s2089_s11 }
  0x26   : > { %v2905_v33 = vld [vmem:[%s3272_s2 + $0x108] sm:$0xff]  ;;  %v2910_v34 = vld [vmem:[%s3272_s2 + $0x110] sm:$0xff]  ;;  %v2915_v35 = vld [vmem:[%s3272_s2 + $0x118] sm:$0xff] }
  0x27   : > { %v2924_v36 = vld [vmem:[%s3272_s2 + $0x120] sm:$0xff]  ;;  %v2929_v37 = vld [vmem:[%s3272_s2 + $0x128] sm:$0xff]  ;;  %v2934_v38 = vld [vmem:[%s3272_s2 + $0x130] sm:$0xff] }
  0x28   : > { %v2939_v39 = vld [vmem:[%s3272_s2 + $0x138] sm:$0xff]  ;;  %v2944_v40 = vld [vmem:[%s3273_s3] sm:$0xff]  ;;  %v2949_v41 = vld [vmem:[%s3273_s3 + $0x8] sm:$0xff] }
  0x29   : > { %v2954_v42 = vld [vmem:[%s3273_s3 + $0x10] sm:$0xff]  ;;  %v2956_v43 = vld [vmem:[%s375_s16] sm:$0xf]  ;;  %v2958_v44 = vld [vmem:[%s375_s16 + $0x4] sm:$0xf]  ;;  %s2986_s16 = scalar_lea.vmem [#allocation2], %s2733_s19 }
  0x2a   : > { %3302 = vst [vmem:[#allocation13_spill] sm:$0xff] %v2954_v42  ;;  %v2963_v45 = vld [vmem:[%s380_s25] sm:$0xff]  ;;  %v2965_v46 = vld [vmem:[%s380_s25 + $0x8] sm:$0xff]  ;;  %v2969_v49 = vld [vmem:[%s385_s18 + $0x10] sm:$0xff] }
  0x2b   : > { %3303 = vst [vmem:[#allocation14_spill] sm:$0xff] %v2965_v46  ;;  %v438_v47 = vld [vmem:[%s385_s18] sm:$0xff]  ;;  %v2967_v48 = vld [vmem:[%s385_s18 + $0x8] sm:$0xff]  ;;  %v2971_v50 = vld [vmem:[%s385_s18 + $0x18] sm:$0xff]  ;;  %451 = sbr.rel (%p2090_p0) target bundleno = 247 (0xf7), region = 56 }
  0x2c   : > { %v2973_v51 = vld [vmem:[%s385_s18 + $0x20] sm:$0xff]  ;;  %v2975_v52 = vld [vmem:[%s385_s18 + $0x28] sm:$0xff]  ;;  %v2977_v53 = vld [vmem:[%s385_s18 + $0x30] sm:$0xff] }
  0x2d   : > { %v2979_v54 = vld [vmem:[%s385_s18 + $0x38] sm:$0xff]  ;;  %v2981_v55 = vld [vmem:[%s385_s18 + $0x40] ss:$0 sm:$0xff] }
  0x2e   : > { %3304 = vst [vmem:[#allocation15_spill] sm:$0xff] %v2981_v55  ;;  %v2983_v56 = vld [vmem:[%s389_s14] sm:$0x7] }
  0x2f   : > { %3305 = vst [vmem:[#allocation16_spill] sm:$0xff] %v2983_v56 }
  0x30   : > { %v452_v57 = vld [vmem:[%s3271_s1] sm:$0xff]  ;;  %vm455_vm0 = vcmask 64512   ;;  %v2594_v59 = vmov 0.0   ;;  %vm2595_vm1 = vmmov 0   ;;  %v453_v60 = vld [vmem:[%s3271_s1 + $0x8] sm:$0xff] }
  0x31   : > { %v454_v58 = vld [vmem:[%s2818_s13] sm:$0xff]  ;;  %2233 = vmatprep.subr.mxu0 %v2594_v59  ;;  %2235 = vmatprep.mubr.msk.f32.mxu0 %vm2595_vm1, %v2594_v59 }
  0x32   : > { %2234 = vmatpush3.msra.mxu0 %v452_v57 }
  0x33   : > { %2236 = vmatmul.mubr.msk.f32.vlgmr.msra.gmra.mxu0 %vm455_vm0, %v454_v58 }
  0xf3   : > { %v525_v61 = vpop.f32.mrf.mxu0 }
  0xf4   : > { %v526_v62 = vadd.f32 %v525_v61, %v453_v60 }
  0xf5   : > { %v2237_v63 = vpop.f32.mrf.mxu0 }
  0xf6   : > { %529 = vst.msk [vmem:[%s2986_s16] sm:$0xff] %vm455_vm0, %v526_v62 }
  0xf7 PF: > { %vm531_vm2 = vcmask 64512   ;;  %v2596_v61 = vmov 0.0   ;;  %vm2597_vm3 = vmmov 0   ;;  %v546_v63 = vlaneseq  ;;  %s2142_s30 = sshll.u32 %s2580_s9, 7  ;;  %s1959_s13 = sshll.u32 %s2986_s16, 4  ;;  %s1960_s13 = int_to_ptr.vmem [resolvable:$true] %s1959_s13 }
  0xf8   : > { %2245 = vmatprep.mubr.msk.f32.mxu1 %vm531_vm2, %v415_v24  ;;  %2238 = vmatprep.subr.mxu0 %v2596_v61  ;;  %vm774_vm4 = vcmask 523264   ;;  %vm1593_vm5 = vcmask 261120   ;;  %vm1630_vm6 = vcmask 7168   ;;  %s1957_s23 = scalar_lea.hbm %s3278_s8, %s2142_s30  ;;  %s3313_s22 = sand.u32 1, %s2568_s28  }
  0xf9   : > { %2240 = vmatprep.mubr.msk.f32.mxu0 %vm2597_vm3, %v2596_v61  ;;  %2239 = vmatpush3.msra.mxu0 %v438_v47  ;;  %s1946_s15 = scalar_lea.sflag [#allocation3], %s3313_s22  ;;  %s2500_s24 = scalar_lea.vmem %s1960_s13, 128 }
  0xfa   : > { %2257 = vmatprep.subr.bf16.mxu0 %v2596_v61  ;;  %p2501_p1 = scmp.ne.s32.totalorder %s1960_s13, %s2500_s24  ;;  %s2599_s0 = smov [#allocation2]  }
  0xfb   : > { %s2504_s29 = sshll.u32 %s2599_s0, 4  ;;  %s2505_s29 = int_to_ptr.vmem [resolvable:$false] %s2504_s29 }
  0xfc   : > { %p2502_p2 = pnand %p2501_p1, %p2694_p3  ;;  %s2506_s9 = scalar_lea.vmem %s2505_s29, 256 }
  0xfd   : > { %v2998_v46 = vld [vmem:[%s2986_s16] sm:$0xff]  ;;  %p2507_p5 = scmp.lt.s32.totalorder %s1960_s13, %s2505_s29  ;;  %p2508_p6 = scmp.lt.s32.totalorder %s2506_s9, %s2500_s24 }
  0xfe   : > { %3306 = vst [vmem:[#allocation17_spill] sm:$0xff] %v2998_v46  ;;  %v532_v42 = vsel %vm531_vm2, %v2998_v46, 0.0  ;;  %p2503_p4 = pneg %p2502_p2 }
  0xff   : > { %533 = vadd.xlane.f32.xlu0 %v532_v42  ;;  %p2509_p7 = por %p2508_p6, %p2507_p5 }
 0x101   : > { %p2510_p8 = pnand %p2509_p7, %p2503_p4 }
 0x188   : > { %v534_v57 = vpop.xlane.xlu0 %533 }
 0x189   : > { %v536_v58 = vmul.f32 0.125, %v534_v57  ;;  %v3009_v57 = vshrl.u32 %v546_v63, 7 }
 0x18b   : > { %v537_v59 = vsub.f32 %v2998_v46, %v536_v58  ;;  %v3289_v58 = vsub.s32 1, %v3009_v57 }
 0x18d   : > { %v538_v55 = vmul.f32 %v537_v59, %v537_v59  ;;  %v554_v47 = vrot.slane %v2979_v54, %v3289_v58 }
 0x18f   : > { %v539_v60 = vsel %vm531_vm2, %v538_v55, 0.0  ;;  %v548_v55 = vsub.s32 0, %v3009_v57 }
 0x190   : > { %540 = vadd.xlane.f32.xlu0 %v539_v60 }
 0x191   : > { %v549_v60 = vrot.slane %v2979_v54, %v548_v55 }
 0x219   : > { %v541_v24 = vpop.xlane.xlu0 %540 }
 0x21a   : > { %v542_v42 = vmul.f32 0.125, %v541_v24 }
 0x21c   : > { %v543_v62 = vadd.f32 1e-05, %v542_v42 }
 0x21e   : > { %2474 = vrsqrt.f32 %v543_v62 }
 0x22b   : > { %v2475_v46 = vpop.eup %2474 }
 0x22c   : > { %v545_v56 = vmul.f32 %v2475_v46, %v537_v59 }
 0x22e   : > { %v550_v24 = vmul.f32 %v549_v60, %v545_v56 }
 0x230   : > { %v555_v42 = vadd.f32 %v554_v47, %v550_v24 }
 0x232   : > { %2241 = vmatmul.mubr.msk.f32.vlgmr.msra.gmra.mxu0 %vm531_vm2, %v555_v42  ;;  %2243 = vmatprep.subr.mxu1 %v555_v42 }
 0x233   : > { %2244 = vmatpush3.msra.mxu1 %v555_v42  ;;  %2265 = vmatprep.mubr.msk.bf16.mxu0 %vm2597_vm3, %v2596_v61 }
 0x234   : > { %2246 = vmatmul.mubr.msk.f32.vlgmr.msra.gmra.mxu1 %vm531_vm2, %v2859_v25  ;;  %2269 = vmatprep.subr.bf16.mxu1 %v2596_v61 }
 0x235   : > { %2248 = vmatprep.mubr.msk.f32.mxu1 %vm531_vm2, %v2864_v26 }
 0x238   : > { %2249 = vmatmul.mubr.msk.f32.gmra.mxu1 %vm531_vm2, %v2869_v27 }
 0x239   : > { %2251 = vmatprep.mubr.msk.f32.mxu1 %vm531_vm2, %v2874_v28 }
 0x23c   : > { %2252 = vmatmul.mubr.msk.f32.gmra.mxu1 %vm531_vm2, %v2879_v29 }
 0x23d   : > { %2254 = vmatprep.mubr.msk.f32.mxu1 %vm531_vm2, %v2884_v30 }
 0x240   : > { %2255 = vmatmul.mubr.msk.f32.gmra.mxu1 %vm531_vm2, %v2889_v31 }
 0x241   : > { %2277 = vmatprep.mubr.msk.bf16.mxu1 %vm2597_vm3, %v2596_v61 }
 0x2f2   : > { %v3039_v25 = vpop.f32.mrf.mxu0 }
 0x2f4   : > { %v2242_v26 = vpop.f32.mrf.mxu0  ;;  %v2247_v46 = vpop.f32.mrf.mxu1 }
 0x2f6   : > { %v723_v27 = vpop.f32.mrf.mxu1 }
 0x2f8   : > { %v2250_v56 = vpop.f32.mrf.mxu1 }
 0x2f9   : > { %v765_v58 = vmul.f32 %v2250_v56, %v2915_v35 }
 0x2fa   : > { %v733_v59 = vpop.f32.mrf.mxu1 }
 0x2fb   : > { %v764_v42 = vmul.f32 %v733_v59, %v2910_v34 }
 0x2fc   : > { %v2253_v28 = vpop.f32.mrf.mxu1 }
 0x2fd   : > { %v767_v24 = vmul.f32 %v2253_v28, %v2929_v37  ;;  %v771_v37 = vpack.c.bf16 %v765_v58, %v764_v42 }
 0x2fe   : > { %v743_v62 = vpop.f32.mrf.mxu1 }
 0x2ff   : > { %v766_v31 = vmul.f32 %v743_v62, %v2924_v36  ;;  %v762_v36 = vmul.f32 %v723_v27, %v2894_v32 }
 0x300   : > { %v2256_v63 = vpop.f32.mrf.mxu1 }
 0x301   : > { %v769_v60 = vmul.f32 %v2256_v63, %v2939_v39  ;;  %v772_v26 = vpack.c.bf16 %v767_v24, %v766_v31 }
 0x302   : > { %v753_v29 = vpop.f32.mrf.mxu1 }
 0x303   : > { %v768_v30 = vmul.f32 %v753_v29, %v2934_v38  ;;  %v763_v38 = vmul.f32 %v2247_v46, %v2905_v33 }
 0x305   : > { %v773_v47 = vpack.c.bf16 %v769_v60, %v768_v30  ;;  %v770_v34 = vpack.c.bf16 %v763_v38, %v762_v36  ;;  %v876_v38 = vsub.s32 2, %v3009_v57 }
 0x307   : > { %2258 = vmatpush3.bf16.msra.mxu0 %v773_v47  ;;  %2270 = vmatpush3.bf16.msra.mxu1 %v773_v47 }
 0x308   : > { %2259 = vmatprep.subr.bf16.mxu0 %v2596_v61  ;;  %2271 = vmatprep.subr.bf16.mxu1 %v2596_v61 }
 0x30b   : > { %2260 = vmatpush3.bf16.msra.mxu0 %v772_v26  ;;  %2272 = vmatpush3.bf16.msra.mxu1 %v772_v26 }
 0x30c   : > { %2261 = vmatprep.subr.bf16.mxu0 %v2596_v61  ;;  %2273 = vmatprep.subr.bf16.mxu1 %v2596_v61 }
 0x30f   : > { %2262 = vmatpush3.bf16.msra.mxu0 %v771_v37  ;;  %2274 = vmatpush3.bf16.msra.mxu1 %v771_v37 }
 0x310   : > { %2263 = vmatprep.subr.bf16.mxu0 %v2596_v61  ;;  %2275 = vmatprep.subr.bf16.mxu1 %v2596_v61 }
 0x313   : > { %2264 = vmatpush3.bf16.msra.mxu0 %v770_v34  ;;  %2276 = vmatpush3.bf16.msra.mxu1 %v770_v34  ;;  %v881_v34 = vsub.s32 3, %v3009_v57 }
 0x314   : > { %2281 = vmatprep.subr.mxu0 %v2596_v61 }
 0x316   : > { %2266 = vmatmul.mubr.msk.bf16.vlgmr.msra.gmra.mxu0 %vm774_vm4, %v2956_v43  ;;  %2278 = vmatmul.mubr.msk.bf16.vlgmr.msra.gmra.mxu1 %vm774_vm4, %v2958_v44 }
 0x317   : > { %2282 = vmatpush3.msra.mxu0 %v2944_v40  ;;  %2283 = vmatprep.mubr.msk.f32.mxu0 %vm2597_vm3, %v2596_v61 }
 0x318   : > { %2300 = vmatprep.subr.mxu0 %v2596_v61  ;;  %2288 = vmatprep.mubr.msk.f32.mxu1 %vm531_vm2, %v2764_v8 }
 0x3d6   : > { %v812_v32 = vpop.f32.mrf.mxu0  ;;  %v855_v33 = vpop.f32.mrf.mxu1 }
 0x3d7   : > { %v813_v35 = vadd.f32 %v812_v32, %v2975_v52  ;;  %v856_v39 = vadd.f32 %v855_v33, %v2977_v53  ;;  %v877_v32 = vrot.slane %v2979_v54, %v876_v38 }
 0x3d8   : > { %v2267_v43 = vpop.f32.mrf.mxu0  ;;  %v2279_v58 = vpop.f32.mrf.mxu1 }
 0x3d9   : > { %v884_v44 = vsel %vm531_vm2, %v856_v39, 0.0  ;;  %v861_v27 = vsel %vm531_vm2, %v813_v35, 0.0 }
 0x3da   : > { %885 = vadd.xlane.f32.xlu1 %v884_v44  ;;  %v815_v40 = vpop.f32.mrf.mxu0  ;;  %v858_v46 = vpop.f32.mrf.mxu1 }
 0x3dc   : > { %v2268_v56 = vpop.f32.mrf.mxu0  ;;  %v2280_v59 = vpop.f32.mrf.mxu1 }
 0x3de   : > { %862 = vadd.xlane.f32.xlu1 %v861_v27 }
 0x463   : > { %v886_v28 = vpop.xlane.xlu1 %885 }
 0x464   : > { %v887_v8 = vmul.f32 0.125, %v886_v28 }
 0x466   : > { %v888_v62 = vsub.f32 %v856_v39, %v887_v8  ;;  %v882_v39 = vrot.slane %v2979_v54, %v881_v34 }
 0x467   : > { %v863_v63 = vpop.xlane.xlu1 %862 }
 0x468   : > { %v864_v29 = vmul.f32 0.125, %v863_v63  ;;  %v889_v52 = vmul.f32 %v888_v62, %v888_v62 }
 0x46a   : > { %v865_v60 = vsub.f32 %v813_v35, %v864_v29  ;;  %v890_v53 = vsel %vm531_vm2, %v889_v52, 0.0 }
 0x46b   : > { %891 = vadd.xlane.f32.xlu0 %v890_v53 }
 0x46c   : > { %v866_v30 = vmul.f32 %v865_v60, %v865_v60 }
 0x46e   : > { %v867_v31 = vsel %vm531_vm2, %v866_v30, 0.0 }
 0x46f   : > { %868 = vadd.xlane.f32.xlu1 %v867_v31 }
 0x4f4   : > { %v892_v47 = vpop.xlane.xlu0 %891 }
 0x4f5   : > { %v893_v24 = vmul.f32 0.125, %v892_v47 }
 0x4f7   : > { %v894_v42 = vadd.f32 1e-05, %v893_v24 }
 0x4f8   : > { %v869_v26 = vpop.xlane.xlu1 %868 }
 0x4f9   : > { %2476 = vrsqrt.f32 %v894_v42  ;;  %v870_v36 = vmul.f32 0.125, %v869_v26 }
 0x4fb   : > { %v871_v37 = vadd.f32 1e-05, %v870_v36 }
 0x4fd   : > { %2478 = vrsqrt.f32 %v871_v37 }
 0x506   : > { %v2477_v33 = vpop.eup %2476 }
 0x507   : > { %v896_v35 = vmul.f32 %v2477_v33, %v888_v62 }
 0x509   : > { %v897_v43 = vmul.f32 %v896_v35, %v877_v32 }
 0x50a   : > { %v2479_v58 = vpop.eup %2478 }
 0x50b   : > { %v873_v44 = vmul.f32 %v2479_v58, %v865_v60  ;;  %v898_v40 = vadd.f32 %v897_v43, %v882_v39 }
 0x50d   : > { %2284 = vmatmul.mubr.msk.f32.vlgmr.msra.gmra.mxu0 %vm531_vm2, %v898_v40  ;;  %v878_v46 = vmul.f32 %v877_v32, %v873_v44 }
 0x50e   : > { %2301 = vmatpush3.msra.mxu0 %v2949_v41  ;;  %2302 = vmatprep.mubr.msk.f32.mxu0 %vm2597_vm3, %v2596_v61 }
 0x50f   : > { %v883_v27 = vadd.f32 %v882_v39, %v878_v46 }
 0x511   : > { %2303 = vmatmul.mubr.msk.f32.vlgmr.msra.gmra.mxu0 %vm531_vm2, %v883_v27 }
 0x512   : > { %2307 = vmatprep.mubr.msk.f32.mxu0 %vm531_vm2, %v2719_v0 }
 0x5cd   : > { %v968_v56 = vpop.f32.mrf.mxu0 }
 0x5ce   : > { %2286 = vmatprep.subr.mxu1 %v968_v56 }
 0x5cf   : > { %v2285_v59 = vpop.f32.mrf.mxu0  ;;  %2287 = vmatpush3.msra.mxu1 %v968_v56 }
 0x5d0   : > { %2289 = vmatmul.mubr.msk.f32.vlgmr.msra.gmra.mxu1 %vm531_vm2, %v2770_v9  ;;  %2319 = vmatprep.subr.mxu1 %v2849_v23 }
 0x5d1   : > { %v1170_v28 = vpop.f32.mrf.mxu0  ;;  %2291 = vmatprep.mubr.msk.f32.mxu1 %vm531_vm2, %v2775_v10  ;;  %2320 = vmatpush3.msra.mxu1 %v2849_v23 }
 0x5d2   : > { %2305 = vmatprep.subr.mxu0 %v1170_v28  ;;  %2321 = vmatprep.subr.mxu1 %v2844_v22 }
 0x5d3   : > { %v2304_v41 = vpop.f32.mrf.mxu0  ;;  %2306 = vmatpush3.msra.mxu0 %v1170_v28  ;;  %2322 = vmatpush3.msra.mxu1 %v2844_v22 }
 0x5d4   : > { %2308 = vmatmul.mubr.msk.f32.vlgmr.msra.gmra.mxu0 %vm531_vm2, %v2724_v1  ;;  %2292 = vmatmul.mubr.msk.f32.gmra.mxu1 %vm531_vm2, %v2780_v11 }
 0x5d5   : > { %2310 = vmatprep.mubr.msk.f32.mxu0 %vm531_vm2, %v2729_v2  ;;  %2294 = vmatprep.mubr.msk.f32.mxu1 %vm531_vm2, %v2788_v12 }
 0x5d6   : > { %2323 = vmatprep.subr.mxu1 %v2839_v21  ;;  %2347 = vmatprep.subr.mxu0 %v2963_v45 }
 0x5d7   : > { %2324 = vmatpush3.msra.mxu1 %v2839_v21  ;;  %2348 = vmatpush3.msra.mxu0 %v2963_v45 }
 0x5d8   : > { %2311 = vmatmul.mubr.msk.f32.gmra.mxu0 %vm531_vm2, %v2739_v3  ;;  %2295 = vmatmul.mubr.msk.f32.gmra.mxu1 %vm531_vm2, %v2793_v13 }
 0x5d9   : > { %2313 = vmatprep.mubr.msk.f32.mxu0 %vm531_vm2, %v2744_v4  ;;  %2297 = vmatprep.mubr.msk.f32.mxu1 %vm531_vm2, %v2798_v14 }
 0x5da   : > { %2325 = vmatprep.subr.mxu1 %v2833_v20  ;;  %2385 = vmatprep.subr.mxu0 %v2596_v61 }
 0x5db   : > { %2326 = vmatpush3.msra.mxu1 %v2833_v20 }
 0x5dc   : > { %2314 = vmatmul.mubr.msk.f32.gmra.mxu0 %vm531_vm2, %v2749_v5  ;;  %2298 = vmatmul.mubr.msk.f32.gmra.mxu1 %vm531_vm2, %v2803_v15 }
 0x5dd   : > { %2316 = vmatprep.mubr.msk.f32.mxu0 %vm531_vm2, %v2754_v6  ;;  %2327 = vmatprep.subr.mxu1 %v2828_v19 }
 0x5de   : > { %2328 = vmatpush3.msra.mxu1 %v2828_v19 }
 0x5df   : > { %2329 = vmatprep.subr.mxu1 %v2823_v18 }
 0x5e0   : > { %2317 = vmatmul.mubr.msk.f32.gmra.mxu0 %vm531_vm2, %v2759_v7  ;;  %2330 = vmatpush3.msra.mxu1 %v2823_v18 }
 0x5e1   : > { %2331 = vmatprep.subr.mxu1 %v2813_v17 }
 0x5e2   : > { %2332 = vmatpush3.msra.mxu1 %v2813_v17 }
 0x5e3   : > { %2333 = vmatprep.subr.mxu1 %v2808_v16 }
 0x5e4   : > { %2334 = vmatpush3.msra.mxu1 %v2808_v16 }
 0x5e5   : > { %2361 = vmatprep.subr.mxu1 %v2596_v61 }
 0x690   : > { %v2290_v0 = vpop.f32.mrf.mxu1 }
 0x692   : > { %v1062_v1 = vpop.f32.mrf.mxu1 }
 0x694   : > { %v2309_v2 = vpop.f32.mrf.mxu0  ;;  %v2293_v3 = vpop.f32.mrf.mxu1 }
 0x695   : > { %v1304_v7 = vmul.f32 %v2309_v2, %v2290_v0 }
 0x696   : > { %v1264_v4 = vpop.f32.mrf.mxu0  ;;  %v1072_v5 = vpop.f32.mrf.mxu1 }
 0x697   : > { %v1303_v6 = vmul.f32 %v1264_v4, %v1062_v1 }
 0x698   : > { %v2312_v9 = vpop.f32.mrf.mxu0  ;;  %v2296_v10 = vpop.f32.mrf.mxu1 }
 0x699   : > { %2335 = vmatprep.mubr.msk.f32.mxu1 %vm774_vm4, %v1303_v6  ;;  %v1306_v14 = vmul.f32 %v2312_v9, %v2293_v3 }
 0x69a   : > { %v1274_v11 = vpop.f32.mrf.mxu0  ;;  %2336 = vmatmul.mubr.msk.f32.vlgmr.msra.gmra.mxu1 %vm774_vm4, %v1304_v7  ;;  %v1082_v12 = vpop.f32.mrf.mxu1 }
 0x69b   : > { %v1305_v13 = vmul.f32 %v1274_v11, %v1072_v5 }
 0x69c   : > { %v2315_v15 = vpop.f32.mrf.mxu0  ;;  %v2299_v17 = vpop.f32.mrf.mxu1 }
 0x69d   : > { %2338 = vmatprep.mubr.msk.f32.mxu1 %vm774_vm4, %v1305_v13  ;;  %v1308_v19 = vmul.f32 %v2315_v15, %v2296_v10 }
 0x69e   : > { %v1284_v16 = vpop.f32.mrf.mxu0  ;;  %2339 = vmatmul.mubr.msk.f32.gmra.mxu1 %vm774_vm4, %v1306_v14  ;;  %v1092_v21 = vpop.f32.mrf.mxu1 }
 0x69f   : > { %v1307_v18 = vmul.f32 %v1284_v16, %v1082_v12 }
 0x6a0   : > { %v2318_v20 = vpop.f32.mrf.mxu0 }
 0x6a1   : > { %2341 = vmatprep.mubr.msk.f32.mxu1 %vm774_vm4, %v1307_v18  ;;  %v1310_v45 = vmul.f32 %v2318_v20, %v2299_v17 }
 0x6a2   : > { %v1294_v22 = vpop.f32.mrf.mxu0  ;;  %2342 = vmatmul.mubr.msk.f32.gmra.mxu1 %vm774_vm4, %v1308_v19 }
 0x6a3   : > { %v1309_v23 = vmul.f32 %v1294_v22, %v1092_v21  ;;  %v3308_v22 = vld [vmem:[#allocation15_spill] sm:$0xff] }
 0x6a5   : > { %2344 = vmatprep.mubr.msk.f32.mxu1 %vm774_vm4, %v1309_v23 }
 0x6a6   : > { %2345 = vmatmul.mubr.msk.f32.gmra.mxu1 %vm774_vm4, %v1310_v45 }
 0x6a7   : > { %2377 = vmatprep.mubr.msk.f32.mxu1 %vm2597_vm3, %v2596_v61 }
 0x75a   : > { %v2337_v8 = vpop.f32.mrf.mxu1 }
 0x75c   : > { %v1401_v62 = vpop.f32.mrf.mxu1 }
 0x75d   : > { %2349 = vmatprep.mubr.msk.f32.mxu0 %vm531_vm2, %v1401_v62 }
 0x75e   : > { %v2340_v63 = vpop.f32.mrf.mxu1  ;;  %2350 = vmatmul.mubr.msk.f32.vlgmr.msra.gmra.mxu0 %vm531_vm2, %v2337_v8 }
 0x75f   : > { %2386 = vmatpush3.msra.mxu0 %v2973_v51 }
 0x760   : > { %v1411_v29 = vpop.f32.mrf.mxu1  ;;  %2387 = vmatprep.subr.mxu0 %v2596_v61 }
 0x761   : > { %2352 = vmatprep.mubr.msk.f32.mxu0 %vm531_vm2, %v1411_v29  ;;  %2388 = vmatpush3.msra.mxu0 %v2971_v50 }
 0x762   : > { %v2343_v52 = vpop.f32.mrf.mxu1  ;;  %2353 = vmatmul.mubr.msk.f32.gmra.mxu0 %vm531_vm2, %v2340_v63  ;;  %2389 = vmatprep.subr.mxu0 %v2596_v61 }
 0x763   : > { %2390 = vmatpush3.msra.mxu0 %v2969_v49  ;;  %v3307_v49 = vld [vmem:[#allocation16_spill] sm:$0xff] }
 0x764   : > { %v1421_v60 = vpop.f32.mrf.mxu1  ;;  %2391 = vmatprep.subr.mxu0 %v2596_v61  ;;  %v1443_v50 = vrot.slane %v3307_v49, %v548_v55 }
 0x765   : > { %2355 = vmatprep.mubr.msk.f32.mxu0 %vm531_vm2, %v1421_v60  ;;  %2392 = vmatpush3.msra.mxu0 %v2967_v48  ;;  %v1584_v48 = vrot.slane %v3307_v49, %v876_v38 }
 0x766   : > { %v2346_v51 = vpop.f32.mrf.mxu1  ;;  %2356 = vmatmul.mubr.msk.f32.gmra.mxu0 %vm531_vm2, %v2343_v52 }
 0x768   : > { %v1431_v53 = vpop.f32.mrf.mxu1 }
 0x769   : > { %2358 = vmatprep.mubr.msk.f32.mxu0 %vm531_vm2, %v1431_v53 }
 0x76a   : > { %2359 = vmatmul.mubr.msk.f32.gmra.mxu0 %vm531_vm2, %v2346_v51 }
 0x76b   : > { %2393 = vmatprep.mubr.msk.f32.mxu0 %vm2597_vm3, %v2596_v61 }
 0x81e   : > { %v2351_v30 = vpop.f32.mrf.mxu0 }
 0x81f   : > { %v1540_v31 = vadd.f32 %v2351_v30, %v1443_v50 }
 0x820   : > { %v1534_v47 = vpop.f32.mrf.mxu0 }
 0x821   : > { %v1574_v24 = vmax.f32 %v1540_v31, 0.0  ;;  %v1535_v42 = vadd.f32 %v1534_v47, %v1443_v50 }
 0x822   : > { %v2354_v26 = vpop.f32.mrf.mxu0 }
 0x823   : > { %v1573_v36 = vmax.f32 %v1535_v42, 0.0  ;;  %v1550_v37 = vadd.f32 %v2354_v26, %v1443_v50  ;;  %v1586_v34 = vmul.f32 %v1584_v48, %v1574_v24 }
 0x824   : > { %v1544_v32 = vpop.f32.mrf.mxu0 }
 0x825   : > { %v1576_v33 = vmax.f32 %v1550_v37, 0.0  ;;  %v1545_v35 = vadd.f32 %v1544_v32, %v1443_v50  ;;  %v1597_v39 = vsel %vm1593_vm5, %v1586_v34, 0.0  ;;  %v1585_v55 = vmul.f32 %v1584_v48, %v1573_v36 }
 0x826   : > { %1598 = vadd.xlane.f32.xlu1 %v1597_v39  ;;  %v2357_v43 = vpop.f32.mrf.mxu0 }
 0x827   : > { %v1575_v58 = vmax.f32 %v1545_v35, 0.0  ;;  %v1560_v44 = vadd.f32 %v2357_v43, %v1443_v50  ;;  %v1594_v38 = vsel %vm1593_vm5, %v1585_v55, 0.0  ;;  %v1588_v40 = vmul.f32 %v1584_v48, %v1576_v33 }
 0x828   : > { %v1554_v46 = vpop.f32.mrf.mxu0  ;;  %1595 = vadd.xlane.f32.xlu0 %v1594_v38 }
 0x829   : > { %v1578_v27 = vmax.f32 %v1560_v44, 0.0  ;;  %v1555_v56 = vadd.f32 %v1554_v46, %v1443_v50  ;;  %v1603_v59 = vsel %vm1593_vm5, %v1588_v40, 0.0  ;;  %v1587_v28 = vmul.f32 %v1584_v48, %v1575_v58 }
 0x82a   : > { %1604 = vadd.xlane.f32.xlu1 %v1603_v59  ;;  %v2360_v41 = vpop.f32.mrf.mxu0 }
 0x82b   : > { %v1577_v0 = vmax.f32 %v1555_v56, 0.0  ;;  %v1570_v1 = vadd.f32 %v2360_v41, %v1443_v50  ;;  %v1600_v2 = vsel %vm1593_vm5, %v1587_v28, 0.0  ;;  %v1590_v3 = vmul.f32 %v1584_v48, %v1578_v27 }
 0x82c   : > { %1601 = vadd.xlane.f32.xlu0 %v1600_v2  ;;  %v1564_v4 = vpop.f32.mrf.mxu0 }
 0x82d   : > { %v1580_v5 = vmax.f32 %v1570_v1, 0.0  ;;  %v1565_v6 = vadd.f32 %v1564_v4, %v1443_v50  ;;  %v1609_v7 = vsel %vm1593_vm5, %v1590_v3, 0.0  ;;  %v1589_v9 = vmul.f32 %v1584_v48, %v1577_v0 }
 0x82e   : > { %1610 = vadd.xlane.f32.xlu1 %v1609_v7 }
 0x82f   : > { %v1579_v10 = vmax.f32 %v1565_v6, 0.0  ;;  %v1606_v11 = vsel %vm1593_vm5, %v1589_v9, 0.0  ;;  %v1592_v12 = vmul.f32 %v1584_v48, %v1580_v5 }
 0x830   : > { %1607 = vadd.xlane.f32.xlu0 %v1606_v11 }
 0x831   : > { %v1615_v13 = vsel %vm1593_vm5, %v1592_v12, 0.0  ;;  %v1591_v14 = vmul.f32 %v1584_v48, %v1579_v10 }
 0x832   : > { %1616 = vadd.xlane.f32.xlu1 %v1615_v13 }
 0x833   : > { %v1612_v15 = vsel %vm1593_vm5, %v1591_v14, 0.0 }
 0x834   : > { %1613 = vadd.xlane.f32.xlu0 %v1612_v15 }
 0x8af   : > { %v1599_v16 = vpop.xlane.xlu1 %1598 }
 0x8b0   : > { %v1623_v62 = vadd.f32 %v3308_v22, %v1599_v16 }
 0x8b1   : > { %v1596_v17 = vpop.xlane.xlu0 %1595 }
 0x8b2   : > { %v1622_v23 = vadd.f32 %v3308_v22, %v1596_v17  ;;  %v1632_v24 = vsel %vm1630_vm6, %v1623_v62, -inf }
 0x8b3   : > { %v1605_v18 = vpop.xlane.xlu1 %1604 }
 0x8b4   : > { %v1625_v29 = vadd.f32 %v3308_v22, %v1605_v18  ;;  %v1631_v50 = vsel %vm1630_vm6, %v1622_v23, -inf }
 0x8b5   : > { %v1602_v19 = vpop.xlane.xlu0 %1601 }
 0x8b6   : > { %v1624_v52 = vadd.f32 %v3308_v22, %v1602_v19  ;;  %v1634_v42 = vsel %vm1630_vm6, %v1625_v29, -inf  ;;  %v3309_v19 = vld [vmem:[#allocation13_spill] sm:$0xff] }
 0x8b7   : > { %v1611_v20 = vpop.xlane.xlu1 %1610 }
 0x8b8   : > { %v1627_v45 = vadd.f32 %v3308_v22, %v1611_v20  ;;  %v1633_v26 = vsel %vm1630_vm6, %v1624_v52, -inf  ;;  %v3310_v20 = vld [vmem:[#allocation14_spill] sm:$0xff] }
 0x8b9   : > { %v1608_v21 = vpop.xlane.xlu0 %1607 }
 0x8ba   : > { %v1626_v8 = vadd.f32 %v3308_v22, %v1608_v21  ;;  %v1637_v30 = vsel %vm1630_vm6, %v1627_v45, -inf  ;;  %v2598_v21 = vmov 0  }
 0x8bb   : > { %v1617_v63 = vpop.xlane.xlu1 %1616  ;;  %v1638_v37 = vmax.f32 %v1632_v24, %v1637_v30  ;;  %2473 = vset.pattern.permute.xlu0 %v2598_v21 }
 0x8bc   : > { %v1635_v60 = vsel %vm1630_vm6, %v1626_v8, -inf  ;;  %v1629_v51 = vadd.f32 %v3308_v22, %v1617_v63 }
 0x8bd   : > { %v1614_v53 = vpop.xlane.xlu0 %1613  ;;  %v1636_v47 = vmax.f32 %v1631_v50, %v1635_v60 }
 0x8be   : > { %v1641_v48 = vsel %vm1630_vm6, %v1629_v51, -inf  ;;  %v1628_v31 = vadd.f32 %v3308_v22, %v1614_v53 }
 0x8bf   : > { %v1642_v34 = vmax.f32 %v1634_v42, %v1641_v48  ;;  %v1643_v33 = vmax.f32 %v1636_v47, %v1638_v37  ;;  %v3311_v47 = vld [vmem:[#allocation17_spill] sm:$0xff]  ;;  %v3312_v42 = vsub.s32 1, %v3009_v57 }
 0x8c0   : > { %v1639_v36 = vsel %vm1630_vm6, %v1628_v31, -inf }
 0x8c1   : > { %v1640_v32 = vmax.f32 %v1633_v26, %v1639_v36  ;;  %v1768_v26 = vrot.slane %v3307_v49, %v3312_v42 }
 0x8c3   : > { %v1644_v35 = vmax.f32 %v1640_v32, %v1642_v34  ;;  %v1845_v32 = vsub.s32 5, %v3009_v57 }
 0x8c5   : > { %v1645_v39 = vmax.f32 %v1643_v33, %v1644_v35  ;;  %v1846_v33 = vrot.slane %v2979_v54, %v1845_v32 }
 0x8c7   : > { %v1646_v55 = vrot.slane %v1645_v39, 4 }
 0x8c9   : > { %v1647_v43 = vmax.f32 %v1645_v39, %v1646_v55 }
 0x8cb   : > { %v1648_v58 = vrot.slane %v1647_v43, 2 }
 0x8cd   : > { %v1649_v44 = vmax.f32 %v1647_v43, %v1648_v58 }
 0x8cf   : > { %v1650_v38 = vrot.slane %v1649_v44, 1 }
 0x8d1   : > { %v1651_v40 = vmax.f32 %v1649_v44, %v1650_v38 }
 0x8d3   : > { %v1659_v46 = vsub.f32 %v1629_v51, %v1651_v40  ;;  %v1658_v27 = vsub.f32 %v1628_v31, %v1651_v40  ;;  %v1657_v56 = vsub.f32 %v1627_v45, %v1651_v40  ;;  %v1656_v28 = vsub.f32 %v1626_v8, %v1651_v40 }
 0x8d4   : > { %v1655_v0 = vsub.f32 %v1625_v29, %v1651_v40  ;;  %v1654_v2 = vsub.f32 %v1624_v52, %v1651_v40  ;;  %v1653_v4 = vsub.f32 %v1623_v62, %v1651_v40  ;;  %v1652_v6 = vsub.f32 %v1622_v23, %v1651_v40 }
 0x8d5   : > { %v1674_v59 = vmul.f32 1.442695, %v1659_v46  ;;  %v1672_v41 = vmul.f32 1.442695, %v1658_v27  ;;  %v1670_v1 = vmul.f32 1.442695, %v1657_v56 }
 0x8d6   : > { %v1668_v3 = vmul.f32 1.442695, %v1656_v28  ;;  %v1666_v5 = vmul.f32 1.442695, %v1655_v0  ;;  %v1664_v7 = vmul.f32 1.442695, %v1654_v2 }
 0x8d7   : > { %2480 = vpow2.f32 %v1674_v59  ;;  %v1662_v9 = vmul.f32 1.442695, %v1653_v4  ;;  %v1660_v10 = vmul.f32 1.442695, %v1652_v6  ;;  %v558_v62 = vsub.s32 4, %v3009_v57 }
 0x8d8   : > { %2482 = vpow2.f32 %v1672_v41  ;;  %v1936_v28 = vsub.s32 6, %v3009_v57  ;;  %v1941_v41 = vsub.s32 7, %v3009_v57 }
 0x8d9   : > { %2484 = vpow2.f32 %v1670_v1  ;;  %v559_v63 = vrot.slane %v2979_v54, %v558_v62 }
 0x8da   : > { %2486 = vpow2.f32 %v1668_v3  ;;  %v1937_v0 = vrot.slane %v2979_v54, %v1936_v28  ;;  %v1942_v3 = vrot.slane %v2979_v54, %v1941_v41 }
 0x8db   : > { %2488 = vpow2.f32 %v1666_v5  ;;  %v630_v29 = vadd.f32 %v3039_v25, %v559_v63 }
 0x8dc   : > { %2490 = vpow2.f32 %v1664_v7 }
 0x8dd   : > { %2492 = vpow2.f32 %v1662_v9  ;;  %v1751_v52 = vsel %vm531_vm2, %v630_v29, 0.0 }
 0x8de   : > { %2494 = vpow2.f32 %v1660_v10  ;;  %v1752_v60 = vrot.slane %v1751_v52, 4 }
 0x8e0   : > { %v1753_v51 = vadd.f32 %v1752_v60, %v1751_v52 }
 0x8e2   : > { %v1754_v53 = vrot.slane %v1753_v51, 2 }
 0x8e4   : > { %v2481_v11 = vpop.eup %2480 }
 0x8e5   : > { %2362 = vmatpush3.msra.mxu1 %v2481_v11  ;;  %v2483_v12 = vpop.eup %2482 }
 0x8e6   : > { %2363 = vmatprep.subr.mxu1 %v2596_v61  ;;  %v2485_v13 = vpop.eup %2484 }
 0x8e7   : > { %2364 = vmatpush3.msra.mxu1 %v2483_v12  ;;  %v2487_v14 = vpop.eup %2486 }
 0x8e8   : > { %2365 = vmatprep.subr.mxu1 %v2596_v61  ;;  %v2489_v15 = vpop.eup %2488 }
 0x8e9   : > { %2366 = vmatpush3.msra.mxu1 %v2485_v13  ;;  %v2491_v16 = vpop.eup %2490 }
 0x8ea   : > { %2367 = vmatprep.subr.mxu1 %v2596_v61  ;;  %v2493_v17 = vpop.eup %2492 }
 0x8eb   : > { %2368 = vmatpush3.msra.mxu1 %v2487_v14  ;;  %v2495_v18 = vpop.eup %2494 }
 0x8ec   : > { %2369 = vmatprep.subr.mxu1 %v2596_v61 }
 0x8ed   : > { %2370 = vmatpush3.msra.mxu1 %v2489_v15 }
 0x8ee   : > { %2371 = vmatprep.subr.mxu1 %v2596_v61 }
 0x8ef   : > { %2372 = vmatpush3.msra.mxu1 %v2491_v16 }
 0x8f0   : > { %2373 = vmatprep.subr.mxu1 %v2596_v61 }
 0x8f1   : > { %2374 = vmatpush3.msra.mxu1 %v2493_v17 }
 0x8f2   : > { %2375 = vmatprep.subr.mxu1 %v2596_v61 }
 0x8f3   : > { %2376 = vmatpush3.msra.mxu1 %v2495_v18 }
 0x8f4   : > { %2378 = vmatmul.mubr.msk.f32.vlgmr.msra.gmra.mxu1 %vm774_vm4, %v3309_v19  ;;  %2380 = vmatprep.subr.mxu1 %v2596_v61 }
 0x8f5   : > { %2381 = vmatpush3.msra.mxu1 %v3310_v20  ;;  %2382 = vmatprep.mubr.msk.f32.mxu1 %vm2597_vm3, %v2596_v61  ;;  %v1755_v61 = vadd.f32 %v1754_v53, %v1753_v51 }
 0x8f7   : > { %v1756_v50 = vrot.slane %v1755_v61, 1 }
 0x8f9   : > { %v1757_v30 = vadd.f32 %v1756_v50, %v1755_v61 }
 0x9b4   : > { %v1745_v22 = vpop.f32.mrf.mxu1 }
 0x9b5   : > { %2496 = vrcp.f32 %v1745_v22 }
 0x9b6   : > { %v2379_v23 = vpop.f32.mrf.mxu1 }
 0x9c2   : > { %v2497_v45 = vpop.eup %2496 }
 0x9c3   : > { %v1750_v8 = vmul.f32 %v2497_v45, %v1745_v22 }
 0x9c5   : > { %1760 = vperm.xlu0 %2473, %v1750_v8  }
 0xa40   : > { %v1761_v48 = vpop.permute.xlu0 %1760 }
 0xa41   : > { %v1763_v31 = vmul.f32 %v1761_v48, %v1757_v30 }
 0xa43   : > { %v1764_v24 = vadd.f32 %v1763_v31, %v3311_v47 }
 0xa45   : > { %2383 = vmatmul.mubr.msk.f32.vlgmr.msra.gmra.mxu1 %vm531_vm2, %v1764_v24 }
 0xb05   : > { %v1838_v36 = vpop.f32.mrf.mxu1 }
 0xb06   : > { %v1839_v25 = vadd.f32 %v1838_v36, %v1768_v26 }
 0xb07   : > { %v2384_v37 = vpop.f32.mrf.mxu1 }
 0xb08   : > { %v1842_v34 = vmax.f32 %v1839_v25, 0.0 }
 0xb0a   : > { %2394 = vmatmul.mubr.msk.f32.vlgmr.msra.gmra.mxu0 %vm1593_vm5, %v1842_v34 }
 0xbca   : > { %v1916_v35 = vpop.f32.mrf.mxu0 }
 0xbcb   : > { %v1917_v39 = vadd.f32 %v1916_v35, %v1846_v33 }
 0xbcc   : > { %v2395_v55 = vpop.f32.mrf.mxu0 }
 0xbcd   : > { %v1920_v43 = vadd.f32 %v1917_v39, %v1764_v24 }
 0xbcf   : > { %v1921_v58 = vsel %vm531_vm2, %v1920_v43, 0.0 }
 0xbd0   : > { %1922 = vadd.xlane.f32.xlu1 %v1921_v58 }
 0xc59   : > { %v1923_v44 = vpop.xlane.xlu1 %1922 }
 0xc5a   : > { %v1924_v49 = vmul.f32 0.125, %v1923_v44 }
 0xc5c   : > { %v1925_v38 = vsub.f32 %v1920_v43, %v1924_v49 }
 0xc5e   : > { %v1926_v40 = vmul.f32 %v1925_v38, %v1925_v38 }
 0xc60   : > { %v1927_v46 = vsel %vm531_vm2, %v1926_v40, 0.0 }
 0xc61   : > { %1928 = vadd.xlane.f32.xlu1 %v1927_v46 }
 0xcea   : > { %v1929_v27 = vpop.xlane.xlu1 %1928 }
 0xceb   : > { %v1930_v56 = vmul.f32 0.125, %v1929_v27 }
 0xced   : > { %v1931_v59 = vadd.f32 1e-05, %v1930_v56 }
 0xcef   : > { %2498 = vrsqrt.f32 %v1931_v59 }
 0xcfc   : > { %v2499_v1 = vpop.eup %2498 }
 0xcfd   : > { %v1933_v2 = vmul.f32 %v2499_v1, %v1925_v38 }
 0xcff   : > { %v1938_v4 = vmul.f32 %v1937_v0, %v1933_v2 }
 0xd01   : > { %v1943_v5 = vadd.f32 %v1942_v3, %v1938_v4 }
 0xd03   : > { %1944 = vst.msk [vmem:[%s2986_s16] sm:$0xff] %vm531_vm2, %v1943_v5 }
 0xd04   : > { %2513 = shalt.err (!%p2510_p8)
}
 0xd05   : > { %s2514_s20 = scalar_lea.hbm %s1957_s23, 128  ;;  %s2518_s14 = scalar_lea.hbm %s3278_s8, 256 }
 0xd06   : > { %p2515_p10 = scmp.ne.s32.totalorder %s1957_s23, %s2514_s20  ;;  %p2519_p13 = scmp.lt.s32.totalorder %s1957_s23, %s3278_s8 }
 0xd07   : > { %p2520_p0 = scmp.lt.s32.totalorder %s2518_s14, %s2514_s20 }
 0xd08   : > { %p2516_p11 = pnand %p2515_p10, %p2694_p3 }
 0xd09   : > { %p2521_p1 = por %p2520_p0, %p2519_p13 }
 0xd0a   : > { %p2517_p12 = pneg %p2516_p11 }
 0xd0c   : > { %p2522_p2 = pnand %p2521_p1, %p2517_p12 }
 0xd0e   : > { %2525 = shalt.err (!%p2522_p2)
}
 0xd0f   : > { %2397 = dma.vmem_to_hbm [thread:$0]  (%p2694_p3), %s1960_s13, 128, %s1957_s23, %s1946_s15  }
 0xd10 PF: > { %s3314_s11 = sld [smem:[#allocation5_spill]]  ;;  %p2403_p4 = scmp.ge.s32.totalorder %s2592_s12, 2 }
 0xd12   : > { %p2400_p5 = pnand %p2403_p4, %p2704_p9 }
 0xd14   : > { %p2401_p6 = pneg %p2400_p5 }
 0xd16   : > { %s1971_s19 = sand.u32 1, %s3314_s11  }
 0xd17   : > { %s1972_s30 = scalar_lea.sflag [#allocation3], %s1971_s19 }
 0xd18   : > { %2559 = dma.done.wait (%p2401_p6), %s1972_s30, 128  }
 0xd19   : > { %2561 = vsyncadd (%p2401_p6), %s1972_s30, 4294967168  ;;  %s21_s12 = sadd.s32 1, %s2592_s12   ;;  %s3316_s21 = sld [smem:[#allocation6_spill]] }
 0xd1a   : > { %p18_p7 = scmp.ge.s32.totalorder %s21_s12, 6   ;;  %s3317_s29 = sld [smem:[#allocation12_spill]] }
 0xd1b   : > { %s3318_s30 = sld [smem:[#allocation7_spill]]  ;;  %s3322_s27 = smov %s2568_s28 }
 0xd1c   : > { %s3319_s9 = sld [smem:[#allocation8_spill]]  ;;  %20 = sbr.rel (!%p18_p7) target bundleno = 7 (0x7), region = 103 }
 0xd1d   : > { %s3320_s10 = sld [smem:[#allocation9_spill]] }
 0xd1e   : > { %s3321_s11 = sld [smem:[#allocation10_spill]] }
 0xd1f   : > { %s3323_s28 = smov %s3316_s21 }
 0xd21   :  { %1977 = vsyncpa [#allocation3], 1 }
 0xd22   :  { %1979 = vsyncpa [#allocation3 + $0x1], 1 }

</bundles_post_ra>
